<compile_context>
chip_gen: v7x
topology: tpu7x:2x2x1
jax: 0.10.0
libtpu: 0.0.40
codegen_flags: <defaults>
</compile_context>

<pallas_src>
import functools

import jax
import jax.numpy as jnp
from jax.experimental import pallas as pl
from jax.experimental.pallas import tpu as pltpu


def attention_cross_kernel(x_ref, q_ref, wkv_ref, wout_ref, bout_ref, o_ref,
                           *, heads, dim_head, scale, mm_dtype, H, W):
    # x_ref   : (1, N, C)        N = H * W
    # q_ref   : (1, N, inner)    inner = heads * dim_head
    # wkv_ref : (C, 2 * inner)
    # wout_ref: (inner, dim)
    # bout_ref: (1, dim)
    # o_ref   : (1, N, dim)
    inner = heads * dim_head
    N = H * W
    dim = wout_ref.shape[1]

    x = x_ref[0].astype(mm_dtype)                                    # (N, C)
    # Fold the softmax scale into q once (cheaper than scaling the WxW dots).
    qs = (q_ref[0].astype(jnp.float32) * scale).astype(mm_dtype)     # (N, inner)

    # to_kv: Linear(dim -> 2*inner, bias=False) -- one fat MXU matmul, M = N.
    kv = jnp.dot(x, wkv_ref[...].astype(mm_dtype),
                 preferred_element_type=jnp.float32)                 # (N, 2*inner) f32
    kv = kv.astype(mm_dtype)

    wout = wout_ref[...].astype(mm_dtype)                            # (inner, dim)

    # Output-projection accumulator in f32; the per-head projections below are
    # equivalent to concat(heads) @ Wout, without the concatenate.
    acc = jnp.zeros((N, dim), dtype=jnp.float32)

    # Small static unroll over heads; each iteration is batched over all H
    # image rows, so every matmul is an (H, W, *) batched MXU op.
    for g in range(heads):
        lo = g * dim_head
        hi = lo + dim_head
        # Lane slices + free leading-dim splits (minor dim unchanged).
        q_h = qs[:, lo:hi].reshape(H, W, dim_head)                   # (H, W, dh)
        k_h = kv[:, lo:hi].reshape(H, W, dim_head)                   # (H, W, dh)
        v_h = kv[:, inner + lo:inner + hi].reshape(H, W, dim_head)   # (H, W, dh)

        # Batched NT matmul over the H rows; no explicit transpose of k.
        dots = jnp.einsum("hqd,hkd->hqk", q_h, k_h,
                          preferred_element_type=jnp.float32)        # (H, W, W) f32

        # Numerically-stable softmax over the W axis (kept in f32).
        m = jnp.max(dots, axis=-1, keepdims=True)
        e = jnp.exp(dots - m)
        s = jnp.sum(e, axis=-1, keepdims=True)
        attn = e * pl.reciprocal(s, approx=True)
        # TODO(synk): dropout is p=0.0 in this config; for p>0 mask `attn` with
        # pltpu.prng_seed / pltpu.prng_random_bits.
        # Note: for large W, tile the KV axis flash-style instead of holding
        # the full (H, W, W) dots block.

        out_h = jnp.einsum("hqk,hkd->hqd", attn.astype(mm_dtype), v_h,
                           preferred_element_type=jnp.float32)       # (H, W, dh) f32

        # Per-head slice of the output projection (== concat-then-matmul).
        acc = acc + jnp.dot(out_h.reshape(N, dim_head).astype(mm_dtype),
                            wout[lo:hi, :],
                            preferred_element_type=jnp.float32)      # (N, dim) f32

    proj = acc + bout_ref[...].astype(jnp.float32)                   # (N, dim)
    # Lane-dense, unmasked store (dim is a multiple of 128 in this config).
    o_ref[0] = proj.astype(o_ref.dtype)


def attention_cross(x, q, wkv, wout, bout, *, heads, dim_head, mm_dtype=None):
    """x, q: (B, H, W, C) / (B, H, W, inner); weights stored (in, out)."""
    B, H, W, C = x.shape
    inner = heads * dim_head
    dim = wout.shape[1]
    N = H * W
    scale = dim_head ** -0.5
    if mm_dtype is None:
        # On v6e/v7x pass mm_dtype=jnp.bfloat16 for MXU-native throughput
        # (accumulation & softmax stay f32).
        mm_dtype = x.dtype

    # Free XLA reshapes: present lane-dense (N, feature) slabs to the kernel.
    x2 = x.reshape(B, N, C)
    q2 = q.reshape(B, N, inner)

    kernel = functools.partial(
        attention_cross_kernel, heads=heads, dim_head=dim_head, scale=scale,
        mm_dtype=mm_dtype, H=H, W=W)

    out = pl.pallas_call(
        kernel,
        out_shape=jax.ShapeDtypeStruct((B, N, dim), x.dtype),
        grid_spec=pltpu.PrefetchScalarGridSpec(
            num_scalar_prefetch=0,
            grid=(B,),  # H is fused into the block; >=2 parallel steps for v7x
            in_specs=[
                pl.BlockSpec((1, N, C), lambda b: (b, 0, 0)),
                pl.BlockSpec((1, N, inner), lambda b: (b, 0, 0)),
                pl.BlockSpec((C, 2 * inner), lambda b: (0, 0)),
                pl.BlockSpec((inner, dim), lambda b: (0, 0)),
                pl.BlockSpec((1, dim), lambda b: (0, 0)),
            ],
            out_specs=pl.BlockSpec((1, N, dim), lambda b: (b, 0, 0)),
        ),
        compiler_params=pltpu.CompilerParams(
            dimension_semantics=("parallel",),
            vmem_limit_bytes=32 * 1024 * 1024),  # blocks use <1 MiB; fits v7x 64 MiB easily
    )(x2, q2, wkv, wout, bout)
    return out.reshape(B, H, W, dim)


def attention_cross_ref(x, q, wkv, wout, bout, *, heads, dim_head):
    """Pure-JAX reference mirroring the PyTorch forward exactly."""
    B, H, W, C = x.shape
    inner = heads * dim_head
    scale = dim_head ** -0.5
    kv = jnp.einsum("bhwc,cd->bhwd", x, wkv)                     # (B,H,W,2*inner)
    kv = kv.reshape(B, H, W, 2, heads, dim_head)
    kv = jnp.transpose(kv, (3, 0, 4, 1, 2, 5))                   # (2,B,heads,H,W,dh)
    k, v = kv[0], kv[1]
    qr = q.reshape(B, H, W, heads, dim_head).transpose(0, 3, 1, 2, 4)
    dots = jnp.einsum("bnhwd,bnhvd->bnhwv", qr, k) * scale       # (B,heads,H,W,W)
    attn = jax.nn.softmax(dots, axis=-1)
    out = jnp.einsum("bnhwv,bnhvd->bnhwd", attn, v)
    out = out.transpose(0, 2, 3, 1, 4).reshape(B, H, W, inner)
    return jnp.einsum("bhwi,id->bhwd", out, wout) + bout[0]


if __name__ == "__main__":
    # Small config consistent with the module: the PyTorch forward requires
    # C == heads * dim_head.  dim_head=64 is the module default; heads=2 keeps
    # shapes small while making every feature dim lane-dense (>=128).
    heads, dim_head = 2, 64
    dim = heads * dim_head          # C == inner_dim == 128
    inner = heads * dim_head
    B, H, W = 2, 8, 16

    key = jax.random.PRNGKey(0)
    kx, kq, kw1, kw2, kb = jax.random.split(key, 5)

    x = jax.random.normal(kx, (B, H, W, dim), dtype=jnp.float32)
    q = jax.random.normal(kq, (B, H, W, inner), dtype=jnp.float32)

    # Deterministic parameter init (shapes from nn.Linear defs, stored (in, out)).
    wkv = (jax.random.uniform(kw1, (dim, 2 * inner), dtype=jnp.float32,
                              minval=-1.0, maxval=1.0) * (dim ** -0.5))
    wout = (jax.random.uniform(kw2, (inner, dim), dtype=jnp.float32,
                               minval=-1.0, maxval=1.0) * (inner ** -0.5))
    bout = (jax.random.uniform(kb, (1, dim), dtype=jnp.float32,
                               minval=-1.0, maxval=1.0) * (inner ** -0.5))

    ref = attention_cross_ref(x, q, wkv, wout, bout, heads=heads, dim_head=dim_head)

    # f32 matmul path (default): tight check (tolerance covers approx-EUP recip).
    out = attention_cross(x, q, wkv, wout, bout, heads=heads, dim_head=dim_head)
    out = jax.block_until_ready(out)
    assert out.shape == (B, H, W, dim)
    assert jnp.allclose(out, ref, atol=2e-3, rtol=2e-3), "f32 kernel mismatch vs reference"

    # bf16 matmul-operand path (v6e/v7x MXU feedback): looser check.
    out_bf16 = attention_cross(x, q, wkv, wout, bout, heads=heads,
                               dim_head=dim_head, mm_dtype=jnp.bfloat16)
    out_bf16 = jax.block_until_ready(out_bf16)
    assert jnp.allclose(out_bf16, ref, atol=1e-1, rtol=1e-1), "bf16 kernel mismatch vs reference"

    print("KERNEL_OK")
</pallas_src>

<mosaic_0001>
module attributes {stable_mosaic.version = 11 : i64} {
  func.func @attention_cross_kernel(%arg0: i32, %arg1: memref<1x128x128xf32, #tpu.memory_space<vmem>>, %arg2: memref<1x128x128xf32, #tpu.memory_space<vmem>>, %arg3: memref<128x256xf32, #tpu.memory_space<vmem>>, %arg4: memref<128x128xf32, #tpu.memory_space<vmem>>, %arg5: memref<1x128xf32, #tpu.memory_space<vmem>>, %arg6: memref<1x128x128xf32, #tpu.memory_space<vmem>>) attributes {dimension_semantics = [#tpu.dimension_semantics<parallel>], iteration_bounds = array<i64: 2>, scalar_prefetch = 0 : i64, scratch_operands = 0 : i64, tpu.core_type = #tpu.core_type<tc>, window_params = [{transform_indices = @transform_0, window_bounds = array<i64: 1, 128, 128>}, {transform_indices = @transform_1, window_bounds = array<i64: 1, 128, 128>}, {pipeline_mode = #tpu.pipeline_mode<synchronous>, transform_indices = @transform_2, window_bounds = array<i64: 128, 256>}, {pipeline_mode = #tpu.pipeline_mode<synchronous>, transform_indices = @transform_3, window_bounds = array<i64: 128, 128>}, {pipeline_mode = #tpu.pipeline_mode<synchronous>, transform_indices = @transform_4, window_bounds = array<i64: 1, 128>}, {transform_indices = @transform_5, window_bounds = array<i64: 1, 128, 128>}]} {
    %c0 = arith.constant 0 : index
    %c0_0 = arith.constant 0 : index
    %c0_1 = arith.constant 0 : index
    %0 = vector.load %arg1[%c0, %c0_0, %c0_1] : memref<1x128x128xf32, #tpu.memory_space<vmem>>, vector<1x128x128xf32>
    %1 = vector.shape_cast %0 : vector<1x128x128xf32> to vector<128x128xf32>
    %c0_2 = arith.constant 0 : index
    %c0_3 = arith.constant 0 : index
    %c0_4 = arith.constant 0 : index
    %2 = vector.load %arg2[%c0_2, %c0_3, %c0_4] : memref<1x128x128xf32, #tpu.memory_space<vmem>>, vector<1x128x128xf32>
    %3 = vector.shape_cast %2 : vector<1x128x128xf32> to vector<128x128xf32>
    %cst = arith.constant 1.250000e-01 : f32
    %4 = vector.broadcast %cst : f32 to vector<128x128xf32>
    %5 = arith.mulf %3, %4 : vector<128x128xf32>
    %c0_5 = arith.constant 0 : index
    %c0_6 = arith.constant 0 : index
    %6 = vector.load %arg3[%c0_5, %c0_6] : memref<128x256xf32, #tpu.memory_space<vmem>>, vector<128x256xf32>
    %cst_7 = arith.constant dense<0.000000e+00> : vector<128x256xf32>
    %7 = tpu.matmul %1, %6, %cst_7 {dimension_numbers = #tpu.dot_dimension_numbers<[1], [0], [0], [1], [0, 0, 1, 1], [], []>} : vector<128x128xf32>, vector<128x256xf32>, vector<128x256xf32> -> vector<128x256xf32>
    %c0_8 = arith.constant 0 : index
    %c0_9 = arith.constant 0 : index
    %8 = vector.load %arg4[%c0_8, %c0_9] : memref<128x128xf32, #tpu.memory_space<vmem>>, vector<128x128xf32>
    %cst_10 = arith.constant 0.000000e+00 : f32
    %9 = vector.broadcast %cst_10 : f32 to vector<128x128xf32>
    %10 = vector.extract_strided_slice %5 {offsets = [0, 0], sizes = [128, 64], strides = [1, 1]} : vector<128x128xf32> to vector<128x64xf32>
    %11 = vector.shape_cast %10 : vector<128x64xf32> to vector<8x16x64xf32>
    %12 = vector.extract_strided_slice %7 {offsets = [0, 0], sizes = [128, 64], strides = [1, 1]} : vector<128x256xf32> to vector<128x64xf32>
    %13 = vector.shape_cast %12 : vector<128x64xf32> to vector<8x16x64xf32>
    %14 = vector.extract_strided_slice %7 {offsets = [0, 128], sizes = [128, 64], strides = [1, 1]} : vector<128x256xf32> to vector<128x64xf32>
    %15 = vector.shape_cast %14 : vector<128x64xf32> to vector<8x16x64xf32>
    "tpu.trace_start"() <{level = 10 : i32, message = "hqd,hkd->hqk"}> : () -> ()
    %cst_11 = arith.constant dense<0.000000e+00> : vector<8x16x16xf32>
    %16 = tpu.matmul %11, %13, %cst_11 {dimension_numbers = #tpu.dot_dimension_numbers<[2], [2], [1], [1], [0, 0, 0, 1, 1, 1], [0], [0]>} : vector<8x16x64xf32>, vector<8x16x64xf32>, vector<8x16x16xf32> -> vector<8x16x16xf32>
    "tpu.trace_stop"() : () -> ()
    %cst_12 = arith.constant dense<0xFF800000> : vector<8x16xf32>
    %17 = vector.multi_reduction <maximumf>, %16, %cst_12 [2] : vector<8x16x16xf32> to vector<8x16xf32>
    %18 = vector.shape_cast %17 : vector<8x16xf32> to vector<8x16x1xf32>
    %19 = vector.broadcast %18 : vector<8x16x1xf32> to vector<8x16x16xf32>
    %20 = arith.subf %16, %19 : vector<8x16x16xf32>
    %21 = math.exp %20 : vector<8x16x16xf32>
    %cst_13 = arith.constant dense<0.000000e+00> : vector<8x16xf32>
    %22 = vector.multi_reduction <add>, %21, %cst_13 [2] : vector<8x16x16xf32> to vector<8x16xf32>
    %23 = vector.shape_cast %22 : vector<8x16xf32> to vector<8x16x1xf32>
    %24 = tpu.reciprocal %23 {approx = true} : vector<8x16x1xf32> -> vector<8x16x1xf32>
    %25 = vector.broadcast %24 : vector<8x16x1xf32> to vector<8x16x16xf32>
    %26 = arith.mulf %21, %25 : vector<8x16x16xf32>
    "tpu.trace_start"() <{level = 10 : i32, message = "hqk,hkd->hqd"}> : () -> ()
    %cst_14 = arith.constant dense<0.000000e+00> : vector<8x16x64xf32>
    %27 = tpu.matmul %26, %15, %cst_14 {dimension_numbers = #tpu.dot_dimension_numbers<[2], [1], [1], [2], [0, 0, 0, 1, 1, 2], [0], [0]>} : vector<8x16x16xf32>, vector<8x16x64xf32>, vector<8x16x64xf32> -> vector<8x16x64xf32>
    "tpu.trace_stop"() : () -> ()
    %28 = vector.shape_cast %27 : vector<8x16x64xf32> to vector<128x64xf32>
    %29 = vector.extract_strided_slice %8 {offsets = [0, 0], sizes = [64, 128], strides = [1, 1]} : vector<128x128xf32> to vector<64x128xf32>
    %cst_15 = arith.constant dense<0.000000e+00> : vector<128x128xf32>
    %30 = tpu.matmul %28, %29, %cst_15 {dimension_numbers = #tpu.dot_dimension_numbers<[1], [0], [0], [1], [0, 0, 1, 1], [], []>} : vector<128x64xf32>, vector<64x128xf32>, vector<128x128xf32> -> vector<128x128xf32>
    %31 = arith.addf %9, %30 : vector<128x128xf32>
    %32 = vector.extract_strided_slice %5 {offsets = [0, 64], sizes = [128, 64], strides = [1, 1]} : vector<128x128xf32> to vector<128x64xf32>
    %33 = vector.shape_cast %32 : vector<128x64xf32> to vector<8x16x64xf32>
    %34 = vector.extract_strided_slice %7 {offsets = [0, 64], sizes = [128, 64], strides = [1, 1]} : vector<128x256xf32> to vector<128x64xf32>
    %35 = vector.shape_cast %34 : vector<128x64xf32> to vector<8x16x64xf32>
    %36 = vector.extract_strided_slice %7 {offsets = [0, 192], sizes = [128, 64], strides = [1, 1]} : vector<128x256xf32> to vector<128x64xf32>
    %37 = vector.shape_cast %36 : vector<128x64xf32> to vector<8x16x64xf32>
    "tpu.trace_start"() <{level = 10 : i32, message = "hqd,hkd->hqk"}> : () -> ()
    %cst_16 = arith.constant dense<0.000000e+00> : vector<8x16x16xf32>
    %38 = tpu.matmul %33, %35, %cst_16 {dimension_numbers = #tpu.dot_dimension_numbers<[2], [2], [1], [1], [0, 0, 0, 1, 1, 1], [0], [0]>} : vector<8x16x64xf32>, vector<8x16x64xf32>, vector<8x16x16xf32> -> vector<8x16x16xf32>
    "tpu.trace_stop"() : () -> ()
    %cst_17 = arith.constant dense<0xFF800000> : vector<8x16xf32>
    %39 = vector.multi_reduction <maximumf>, %38, %cst_17 [2] : vector<8x16x16xf32> to vector<8x16xf32>
    %40 = vector.shape_cast %39 : vector<8x16xf32> to vector<8x16x1xf32>
    %41 = vector.broadcast %40 : vector<8x16x1xf32> to vector<8x16x16xf32>
    %42 = arith.subf %38, %41 : vector<8x16x16xf32>
    %43 = math.exp %42 : vector<8x16x16xf32>
    %cst_18 = arith.constant dense<0.000000e+00> : vector<8x16xf32>
    %44 = vector.multi_reduction <add>, %43, %cst_18 [2] : vector<8x16x16xf32> to vector<8x16xf32>
    %45 = vector.shape_cast %44 : vector<8x16xf32> to vector<8x16x1xf32>
    %46 = tpu.reciprocal %45 {approx = true} : vector<8x16x1xf32> -> vector<8x16x1xf32>
    %47 = vector.broadcast %46 : vector<8x16x1xf32> to vector<8x16x16xf32>
    %48 = arith.mulf %43, %47 : vector<8x16x16xf32>
    "tpu.trace_start"() <{level = 10 : i32, message = "hqk,hkd->hqd"}> : () -> ()
    %cst_19 = arith.constant dense<0.000000e+00> : vector<8x16x64xf32>
    %49 = tpu.matmul %48, %37, %cst_19 {dimension_numbers = #tpu.dot_dimension_numbers<[2], [1], [1], [2], [0, 0, 0, 1, 1, 2], [0], [0]>} : vector<8x16x16xf32>, vector<8x16x64xf32>, vector<8x16x64xf32> -> vector<8x16x64xf32>
    "tpu.trace_stop"() : () -> ()
    %50 = vector.shape_cast %49 : vector<8x16x64xf32> to vector<128x64xf32>
    %51 = vector.extract_strided_slice %8 {offsets = [64, 0], sizes = [64, 128], strides = [1, 1]} : vector<128x128xf32> to vector<64x128xf32>
    %cst_20 = arith.constant dense<0.000000e+00> : vector<128x128xf32>
    %52 = tpu.matmul %50, %51, %cst_20 {dimension_numbers = #tpu.dot_dimension_numbers<[1], [0], [0], [1], [0, 0, 1, 1], [], []>} : vector<128x64xf32>, vector<64x128xf32>, vector<128x128xf32> -> vector<128x128xf32>
    %53 = arith.addf %31, %52 : vector<128x128xf32>
    %c0_21 = arith.constant 0 : index
    %c0_22 = arith.constant 0 : index
    %54 = vector.load %arg5[%c0_21, %c0_22] : memref<1x128xf32, #tpu.memory_space<vmem>>, vector<1x128xf32>
    %55 = vector.broadcast %54 : vector<1x128xf32> to vector<128x128xf32>
    %56 = arith.addf %53, %55 : vector<128x128xf32>
    %c0_23 = arith.constant 0 : index
    %c0_24 = arith.constant 0 : index
    %c0_25 = arith.constant 0 : index
    %57 = vector.load %arg6[%c0_23, %c0_24, %c0_25] : memref<1x128x128xf32, #tpu.memory_space<vmem>>, vector<1x128x128xf32>
    %58 = vector.shape_cast %57 : vector<1x128x128xf32> to vector<128x128xf32>
    %59 = vector.shape_cast %56 : vector<128x128xf32> to vector<1x128x128xf32>
    tpu.vector_store %arg6[%c0_23, %c0_24, %c0_25], %59 {strides = array<i32>} : memref<1x128x128xf32, #tpu.memory_space<vmem>>, vector<1x128x128xf32>,
    return
  }
  func.func @transform_0(%arg0: i32) -> (i32, i32, i32) {
    %c0_i32 = arith.constant 0 : i32
    %c0_i32_0 = arith.constant 0 : i32
    %c0_i32_1 = arith.constant 0 : i32
    return %arg0, %c0_i32, %c0_i32_0 : i32, i32, i32
  }
  func.func @transform_1(%arg0: i32) -> (i32, i32, i32) {
    %c0_i32 = arith.constant 0 : i32
    %c0_i32_0 = arith.constant 0 : i32
    %c0_i32_1 = arith.constant 0 : i32
    return %arg0, %c0_i32, %c0_i32_0 : i32, i32, i32
  }
  func.func @transform_2(%arg0: i32) -> (i32, i32) {
    %c0_i32 = arith.constant 0 : i32
    %c0_i32_0 = arith.constant 0 : i32
    %c0_i32_1 = arith.constant 0 : i32
    return %c0_i32, %c0_i32_0 : i32, i32
  }
  func.func @transform_3(%arg0: i32) -> (i32, i32) {
    %c0_i32 = arith.constant 0 : i32
    %c0_i32_0 = arith.constant 0 : i32
    %c0_i32_1 = arith.constant 0 : i32
    return %c0_i32, %c0_i32_0 : i32, i32
  }
  func.func @transform_4(%arg0: i32) -> (i32, i32) {
    %c0_i32 = arith.constant 0 : i32
    %c0_i32_0 = arith.constant 0 : i32
    %c0_i32_1 = arith.constant 0 : i32
    return %c0_i32, %c0_i32_0 : i32, i32
  }
  func.func @transform_5(%arg0: i32) -> (i32, i32, i32) {
    %c0_i32 = arith.constant 0 : i32
    %c0_i32_0 = arith.constant 0 : i32
    %c0_i32_1 = arith.constant 0 : i32
    return %arg0, %c0_i32, %c0_i32_0 : i32, i32, i32
  }
}

</mosaic_0001>

<bundles_post_ra>
// kernel: tpu_custom_call.1
= control target key start
LH: loop header
LB: loop body
LE: loop exit
PB: predicated region body
PF: predicated region fallthrough
CT: control target
= control target key end

     0   :  { %s6838_s0 = inlined_call_operand.hbm [shape: f32[2,128,128], index: 0, kind: input, shape index: {}]   ;;  %s6839_s1 = inlined_call_operand.hbm [shape: f32[2,128,128], index: 1, kind: input, shape index: {}]   ;;  %s6840_s2 = inlined_call_operand.hbm [shape: f32[128,256], index: 2, kind: input, shape index: {}]   ;;  %s6841_s3 = inlined_call_operand.hbm [shape: f32[128,128], index: 3, kind: input, shape index: {}]   ;;  %s6842_s4 = inlined_call_operand.vmem [shape: f32[1,128], index: 4, kind: input, shape index: {}]   ;;  %s6843_s5 = inlined_call_operand.hbm [shape: f32[2,128,128], index: 5, kind: output, shape index: {}]  }
   0x1   :  { %6865 = sst [smem:[#allocation30_spill]] %s6838_s0 }
   0x2   :  { %6866 = sst [smem:[#allocation31_spill]] %s6840_s2 }
   0x3   :  { %10 = vsyncpa [#allocation3], 0 }
   0x4   :  { %12 = vsyncpa [#allocation3 + $0x1], 0 }
   0x5   :  { %13 = vsyncpa [#allocation6], 0 }
   0x6   :  { %15 = vsyncpa [#allocation6 + $0x1], 0 }
   0x7   :  { %16 = vsyncpa [#allocation9], 0 }
   0x8   :  { %17 = vsyncpa [#allocation4], 0 }
   0x9   :  { %19 = vsyncpa [#allocation4 + $0x1], 0  ;;  %s5662_s18 = smov 0   ;;  %s5664_s19 = smov 0  }
   0xa   :  { %s5666_s20 = smov 0   ;;  %s5668_s21 = smov 0  }
   0xb LB: > { %s5683_s22 = sadd.s32 4294967295, %s5617_s21   ;;  %s4261_s23 = sadd.s32 4294967294, %s5617_s21   ;;  %s5617_s21 = sphi %s5668_s21, %s6932_s21   ;;  %s5613_s20 = sphi %s5666_s20, %s6931_s20   ;;  %s5609_s19 = sphi %s5664_s19, %s6930_s19   ;;  %s5605_s18 = sphi %s5662_s18, %s6929_s18  }
   0xc   : > { %p45_p0 = scmp.ne.s32.totalorder %s5609_s19, %s5605_s18  ;;  %p6844_p1 = scmp.eq.s32.totalorder %s5683_s22, 0 }
   0xd   : > { %p164_p3 = scmp.eq.s32.totalorder %s4261_s23, 1  ;;  %p4262_p5 = scmp.ge.s32.totalorder %s5617_s21, 1 }
   0xe   : > { %p5692_p4 = por %p6844_p1, %p45_p0  ;;  %p171_p7 = scmp.lt.s32.totalorder %s5617_s21, 3 }
   0xf   : > { %p5697_p6 = por %p164_p3, %p45_p0  ;;  %s5619_s27 = smov [#allocation7]  }
  0x10   : > { %s6867_s24 = scalar_select %p5692_p4, 1, 0 }
  0x11   : > { %s6868_s25 = scalar_select %p5697_p6, 1, 0 }
  0x12   : > { %p5702_p8 = pnand %p4262_p5, %p171_p7  ;;  %s183_s28 = sshll.u32 %s5619_s27, 4  ;;  %s5706_s28 = int_to_ptr.vmem [resolvable:$true] %s183_s28 }
  0x13   : > { %s5620_s30 = smov [#allocation8]   ;;  %s6871_s2 = sld [smem:[#allocation31_spill]] }
  0x14   : > { %p5149_p9 = pneg %p5702_p8  ;;  %s196_s6 = sshll.u32 %s5620_s30, 4  ;;  %s5717_s6 = int_to_ptr.vmem [resolvable:$true] %s196_s6 }
  0x16   : > { %p5713_p11 = pnand %p5149_p9, %p6844_p1 }
  0x18   : > { %p5425_p13 = pneg %p5713_p11 }
  0x19   : > { %s5423_s9 = scalar_lea.hbm %s6871_s2, 4096 }
  0x1a   : > { %p5424_p12 = scmp.ne.s32.totalorder %s6871_s2, %s5423_s9  ;;  %p5430_p5 = scmp.lt.u32.totalorder %s5423_s9, %s6871_s2 }
  0x1c   : > { %p5426_p0 = pnand %p5425_p13, %p5424_p12 }
  0x1e   : > { %p5427_p3 = pneg %p5426_p0 }
  0x20   : > { %p5432_p7 = pnand %p5430_p5, %p5427_p3 }
  0x22   : > { %5435 = shalt.err (!%p5432_p7)
}
  0x23   : > { %s5436_s14 = scalar_lea.vmem %s5706_s28, 4096  ;;  %p5444_p2 = scmp.lt.s32.totalorder %s5706_s28, %s5706_s28 }
  0x24   : > { %p5437_p9 = scmp.ne.s32.totalorder %s5706_s28, %s5436_s14  ;;  %p5445_p12 = scmp.lt.s32.totalorder %s5436_s14, %s5436_s14 }
  0x26   : > { %p5439_p10 = pnand %p5437_p9, %p5425_p13  ;;  %p5446_p0 = por %p5445_p12, %p5444_p2 }
  0x28   : > { %p5440_p1 = pneg %p5439_p10 }
  0x2a   : > { %p5447_p6 = pnand %p5446_p0, %p5440_p1 }
  0x2c   : > { %5450 = shalt.err (!%p5447_p6)
}
  0x2d   : > { %s5621_s15 = smov 256   ;;  %s5622_s16 = smov 16  }
  0x2e   : > { %5152 = dma.hbm_to_vmem [thread:$0]  (!%p5713_p11), %s6871_s2, 4096, %s5706_s28, [#allocation6], %s5621_s15, %s5621_s15, %s5622_s16  }
  0x2f   : > { %s5451_s7 = scalar_lea.hbm %s6841_s3, 2048 }
  0x30   : > { %p5452_p2 = scmp.ne.s32.totalorder %s6841_s3, %s5451_s7  ;;  %p5458_p10 = scmp.lt.u32.totalorder %s5451_s7, %s6841_s3 }
  0x32   : > { %p5454_p1 = pnand %p5452_p2, %p5425_p13 }
  0x34   : > { %p5455_p6 = pneg %p5454_p1 }
  0x36   : > { %p5460_p3 = pnand %p5458_p10, %p5455_p6 }
  0x38   : > { %5463 = shalt.err (!%p5460_p3)
}
  0x39   : > { %s5464_s28 = scalar_lea.vmem %s5717_s6, 2048  ;;  %p5472_p12 = scmp.lt.s32.totalorder %s5717_s6, %s5717_s6 }
  0x3a   : > { %p5465_p5 = scmp.ne.s32.totalorder %s5717_s6, %s5464_s28  ;;  %p5473_p0 = scmp.lt.s32.totalorder %s5464_s28, %s5464_s28 }
  0x3c   : > { %p5467_p7 = pnand %p5465_p5, %p5425_p13  ;;  %p5474_p2 = por %p5473_p0, %p5472_p12 }
  0x3e   : > { %p5468_p9 = pneg %p5467_p7 }
  0x40   : > { %p5475_p1 = pnand %p5474_p2, %p5468_p9 }
  0x42   : > { %5478 = shalt.err (!%p5475_p1)
}
  0x43   : > { %s6845_s12 = smov 128   ;;  %s6847_s13 = smov 8  }
  0x44   : > { %5155 = dma.hbm_to_vmem [thread:$0]  (!%p5713_p11), %s6841_s3, 2048, %s5717_s6, [#allocation9], %s6845_s12, %s6845_s12, %s6847_s13  }
  0x45   : > { %s5775_s16 = sadd.s32 1, %s5617_s21   ;;  %s32_s23 = sadd.s32 1, %s5613_s20 }
  0x46   : > { %s29_s17 = ssub.s32 %s5617_s21, %s5775_s16  ;;  %p39_p6 = scmp.ne.s32.totalorder %s5613_s20, %s5609_s19 }
  0x47   : > { %p30_p13 = scmp.eq.s32.totalorder %s29_s17, 0  ;;  %p40_p10 = scmp.eq.s32.totalorder %s5617_s21, 0 }
  0x48   : > { %p6872_p5 = scmp.eq.s32.totalorder %s5683_s22, 1  ;;  %p5169_p9 = scmp.lt.s32.totalorder %s5617_s21, 2 }
  0x49   : > { %s5784_s27 = scalar_select %p30_p13, %s5613_s20, %s32_s23  }
  0x4a   : > { %p41_p3 = por %p40_p10, %p39_p6  ;;  %p5788_p7 = por %p6872_p5, %p39_p6 }
  0x4b   : > { %s213_s30 = sand.u32 1, %s5613_s20   ;;  %s4412_s6 = sshll.u32 %s5617_s21, 11 }
  0x4c   : > { %s6873_s29 = scalar_select %p5788_p7, 1, 0 }
  0x4d   : > { %s4266_s7 = sshll.u32 %s213_s30, 7  ;;  %s6874_s0 = sld [smem:[#allocation30_spill]] }
  0x4e   : > { %s217_s11 = scalar_lea.vmem [#allocation2], %s4266_s7  ;;  %p5802_p11 = pnand %p5169_p9, %p41_p3 }
  0x4f   : > { %s224_s28 = sshll.u32 %s217_s11, 4  ;;  %s5809_s23 = scalar_lea.hbm %s6839_s1, %s4412_s6  ;;  %s5800_s28 = int_to_ptr.vmem [resolvable:$true] %s224_s28 }
  0x50   : > { %s238_s8 = scalar_lea.vmem [#allocation5], %s4266_s7  ;;  %s5813_s12 = scalar_lea.sflag [#allocation3], %s213_s30 }
  0x51   : > { %s5811_s9 = sshll.u32 %s238_s8, 4  ;;  %p5481_p0 = pneg %p5802_p11  ;;  %s5845_s9 = int_to_ptr.vmem [resolvable:$true] %s5811_s9 }
  0x53   : > { %s5798_s10 = scalar_lea.hbm %s6874_s0, %s4412_s6  ;;  %s5484_s15 = scalar_lea.hbm %s6874_s0, 4096 }
  0x54   : > { %s5479_s11 = scalar_lea.hbm %s5798_s10, 2048  ;;  %p5485_p13 = scmp.lt.u32.totalorder %s5798_s10, %s6874_s0 }
  0x55   : > { %p5480_p12 = scmp.ne.s32.totalorder %s5798_s10, %s5479_s11  ;;  %p5486_p6 = scmp.lt.u32.totalorder %s5484_s15, %s5479_s11 }
  0x56   : > { %p5488_p3 = scmp.lt.u32.totalorder %s5479_s11, %s5798_s10 }
  0x57   : > { %p5482_p2 = pnand %p5481_p0, %p5480_p12  ;;  %p5487_p10 = por %p5486_p6, %p5485_p13 }
  0x59   : > { %p5483_p1 = pneg %p5482_p2  ;;  %p5489_p5 = por %p5488_p3, %p5487_p10 }
  0x5b   : > { %p5490_p9 = pnand %p5489_p5, %p5483_p1 }
  0x5d   : > { %5493 = shalt.err (!%p5490_p9)
}
  0x5e   : > { %s5494_s30 = scalar_lea.vmem %s5800_s28, 2048  ;;  %s5625_s2 = smov [#allocation2]  }
  0x5f   : > { %p5495_p12 = scmp.ne.s32.totalorder %s5800_s28, %s5494_s30  ;;  %s5499_s13 = sshll.u32 %s5625_s2, 4  ;;  %s5500_s13 = int_to_ptr.vmem [resolvable:$false] %s5499_s13 }
  0x60   : > { %s5501_s7 = scalar_lea.vmem %s5500_s13, 4096  ;;  %p5502_p4 = scmp.lt.s32.totalorder %s5800_s28, %s5500_s13 }
  0x61   : > { %p5497_p2 = pnand %p5495_p12, %p5481_p0  ;;  %p5503_p13 = scmp.lt.s32.totalorder %s5501_s7, %s5494_s30 }
  0x63   : > { %p5498_p7 = pneg %p5497_p2  ;;  %p5504_p6 = por %p5503_p13, %p5502_p4 }
  0x65   : > { %p5505_p10 = pnand %p5504_p6, %p5498_p7 }
  0x67   : > { %5508 = shalt.err (!%p5505_p10)
}
  0x68   : > { %s6876_s8 = smov 8   ;;  %s6877_s11 = smov 128  }
  0x69   : > { %5159 = dma.hbm_to_vmem [thread:$0]  (!%p5802_p11), %s5798_s10, 2048, %s5800_s28, %s5813_s12, %s6877_s11, %s6877_s11, %s6876_s8  }
  0x6a   : > { %s234_s15 = sand.u32 1, %s5617_s21   ;;  %s5509_s6 = scalar_lea.hbm %s5809_s23, 2048 }
  0x6b   : > { %s5848_s17 = scalar_lea.sflag [#allocation6], %s234_s15  ;;  %p5510_p4 = scmp.ne.s32.totalorder %s5809_s23, %s5509_s6 }
  0x6c   : > { %s5514_s13 = scalar_lea.hbm %s6839_s1, 4096  ;;  %p5515_p3 = scmp.lt.u32.totalorder %s5809_s23, %s6839_s1 }
  0x6d   : > { %p5512_p7 = pnand %p5510_p4, %p5481_p0  ;;  %p5516_p5 = scmp.lt.u32.totalorder %s5514_s13, %s5509_s6 }
  0x6e   : > { %p5518_p12 = scmp.lt.u32.totalorder %s5509_s6, %s5809_s23 }
  0x6f   : > { %p5513_p1 = pneg %p5512_p7  ;;  %p5517_p9 = por %p5516_p5, %p5515_p3 }
  0x71   : > { %p5519_p2 = por %p5518_p12, %p5517_p9 }
  0x73   : > { %p5520_p13 = pnand %p5519_p2, %p5513_p1 }
  0x75   : > { %5523 = shalt.err (!%p5520_p13)
}
  0x76   : > { %s5524_s12 = scalar_lea.vmem %s5845_s9, 2048  ;;  %s5626_s10 = smov [#allocation5]  }
  0x77   : > { %p5525_p6 = scmp.ne.s32.totalorder %s5845_s9, %s5524_s12  ;;  %s5529_s28 = sshll.u32 %s5626_s10, 4  ;;  %s5530_s28 = int_to_ptr.vmem [resolvable:$false] %s5529_s28 }
  0x78   : > { %s5531_s0 = scalar_lea.vmem %s5530_s28, 4096  ;;  %p5532_p7 = scmp.lt.s32.totalorder %s5845_s9, %s5530_s28 }
  0x79   : > { %p5527_p10 = pnand %p5525_p6, %p5481_p0  ;;  %p5533_p3 = scmp.lt.s32.totalorder %s5531_s0, %s5524_s12 }
  0x7b   : > { %p5528_p4 = pneg %p5527_p10  ;;  %p5534_p5 = por %p5533_p3, %p5532_p7 }
  0x7d   : > { %p5535_p9 = pnand %p5534_p5, %p5528_p4 }
  0x7f   : > { %5538 = shalt.err (!%p5535_p9)
}
  0x80   : > { %5162 = dma.hbm_to_vmem [thread:$0]  (!%p5802_p11), %s5809_s23, 2048, %s5845_s9, %s5848_s17, %s6877_s11, %s6877_s11, %s6876_s8  }
  0x81   : > { %257 = sbr.rel (%p5702_p8) target bundleno = 2048 (0x800), region = 40 }
  0x88   : > { %s5880_s15 = sand.u32 1, %s5609_s19   ;;  %p6878_p0 = scmp.ne.s32.totalorder %s6867_s24, 0 }
  0x89   : > { %s5883_s6 = sshll.u32 %s5880_s15, 7  ;;  %s260_s14 = scalar_lea.sflag [#allocation3], %s5880_s15 }
  0x8a   : > { %s5887_s30 = scalar_lea.vmem [#allocation2], %s5883_s6 }
  0x8b   : > { %5584 = dma.done.wait (%p6878_p0), %s260_s14, 2048  }
  0x8c   : > { %5586 = vsyncadd (%p6878_p0), %s260_s14, 4294965248  ;;  %s268_s26 = sand.u32 1, %s5683_s22   ;;  %s5895_s9 = scalar_lea.vmem [#allocation5], %s5883_s6 }
  0x8d   : > { %s269_s23 = scalar_lea.sflag [#allocation6], %s268_s26 }
  0x8e   : > { %5588 = dma.done.wait (%p6878_p0), %s269_s23, 2048  }
  0x8f   : > { %5590 = vsyncadd (%p6878_p0), %s269_s23, 4294965248  ;;  %p6879_p8 = scmp.eq.s32.totalorder %s5683_s22, 0 }
  0x91   : > { %5592 = dma.done.wait (%p6879_p8), [#allocation6], 4096   ;;  %p6880_p11 = pmov %p6879_p8 }
  0x92   : > { %p6881_p1 = pmov %p6879_p8 }
  0x93   : > { %5594 = vsyncadd (%p6880_p11), [#allocation6], 4294963200 }
  0x94   : > { %5596 = dma.done.wait (%p6881_p1), [#allocation9], 2048   ;;  %p6882_p12 = pmov %p6881_p1 }
  0x95   : > { %v5627_v0 = vmov 0.0   ;;  %v361_v1 = vld [vmem:[#allocation7 + $0x8] sm:$0xff]  ;;  %v363_v2 = vld [vmem:[#allocation7 + $0x18] sm:$0xff]  ;;  %v360_v3 = vld [vmem:[#allocation7] sm:$0xff]  ;;  %vm569_vm0 = vcmask 523264   ;;  %s5628_s24 = smov 64  }
  0x96   : > { %5598 = vsyncadd (%p6882_p12), [#allocation9], 4294965248  ;;  %456 = vmatprep.mubr.f32.mxu0 %v5627_v0  ;;  %v4895_v4 = vpack.c.bf16 %v363_v2, %v361_v1  ;;  %v362_v5 = vld [vmem:[#allocation7 + $0x10] sm:$0xff]  ;;  %v365_v6 = vld [vmem:[#allocation7 + $0x28] sm:$0xff]  ;;  %vm1266_vm2 = vcmask 130048   ;;  %s6754_s17 = scalar_lea.vmem [#allocation10], %s5883_s6 }
  0x97   : > { %v367_v7 = vld [vmem:[#allocation7 + $0x38] sm:$0xff]  ;;  %v4897_v8 = vpack.c.bf16 %v362_v5, %v360_v3  ;;  %v364_v10 = vld [vmem:[#allocation7 + $0x20] sm:$0xff]  ;;  %v366_v11 = vld [vmem:[#allocation7 + $0x30] sm:$0xff]  ;;  %s4414_s2 = sshll.u32 %s5683_s22, 11  ;;  %s4146_s13 = sshll.u32 %s6754_s17, 4  ;;  %s6791_s13 = int_to_ptr.vmem [resolvable:$true] %s4146_s13 }
  0x98   : > { %v4899_v9 = vpack.c.bf16 %v367_v7, %v365_v6  ;;  %v369_v12 = vld [vmem:[#allocation7 + $0x48] sm:$0xff]  ;;  %4896 = vmatprep.subr.bf16.mxu0 %v4895_v4  ;;  %v371_v13 = vld [vmem:[#allocation7 + $0x58] sm:$0xff]  ;;  %v4901_v14 = vpack.c.bf16 %v366_v11, %v364_v10  ;;  %v368_v16 = vld [vmem:[#allocation7 + $0x40] sm:$0xff]  ;;  %s6789_s10 = scalar_lea.hbm %s6843_s5, %s4414_s2  ;;  %s4133_s22 = scalar_lea.sflag [#allocation4], %s5880_s15 }
  0x99   : > { %4898 = vmatpush1.bf16.msra.mxu0 %v4897_v8  ;;  %v4903_v15 = vpack.c.bf16 %v371_v13, %v369_v12  ;;  %v370_v17 = vld [vmem:[#allocation7 + $0x50] sm:$0xff]  ;;  %v373_v18 = vld [vmem:[#allocation7 + $0x68] sm:$0xff]  ;;  %v375_v19 = vld [vmem:[#allocation7 + $0x78] sm:$0xff]  ;;  %s5539_s28 = scalar_lea.vmem %s6791_s13, 2048  ;;  %p6926_p13 = scmp.ne.s32.totalorder %s6873_s29, 0 }
  0x9a   : > { %4900 = vmatprep.subr.bf16.mxu0 %v4899_v9  ;;  %v4905_v20 = vpack.c.bf16 %v370_v17, %v368_v16  ;;  %v4907_v21 = vpack.c.bf16 %v375_v19, %v373_v18  ;;  %v372_v22 = vld [vmem:[#allocation7 + $0x60] sm:$0xff]  ;;  %v374_v23 = vld [vmem:[#allocation7 + $0x70] sm:$0xff]  ;;  %v377_v24 = vld [vmem:[#allocation7 + $0x88] sm:$0xff]  ;;  %p5540_p2 = scmp.ne.s32.totalorder %s6791_s13, %s5539_s28  ;;  %s5629_s0 = smov [#allocation10]  }
  0x9b   : > { %v379_v25 = vld [vmem:[#allocation7 + $0x98] sm:$0xff]  ;;  %v4909_v26 = vpack.c.bf16 %v374_v23, %v372_v22  ;;  %v376_v28 = vld [vmem:[#allocation7 + $0x80] sm:$0xff]  ;;  %v378_v29 = vld [vmem:[#allocation7 + $0x90] sm:$0xff]  ;;  %s5543_s6 = sshll.u32 %s5629_s0, 4  ;;  %s5544_s6 = int_to_ptr.vmem [resolvable:$false] %s5543_s6 }
  0x9c   : > { %v4911_v27 = vpack.c.bf16 %v379_v25, %v377_v24  ;;  %v381_v30 = vld [vmem:[#allocation7 + $0xa8] sm:$0xff]  ;;  %v383_v31 = vld [vmem:[#allocation7 + $0xb8] sm:$0xff]  ;;  %v4913_v32 = vpack.c.bf16 %v378_v29, %v376_v28  ;;  %v380_v34 = vld [vmem:[#allocation7 + $0xa0] sm:$0xff]  ;;  %p5541_p6 = pnand %p5540_p2, %p6926_p13  ;;  %s5545_s14 = scalar_lea.vmem %s5544_s6, 4096 }
  0x9d   : > { %4902 = vmatpush1.bf16.msra.mxu0 %v4901_v14  ;;  %v4915_v33 = vpack.c.bf16 %v383_v31, %v381_v30  ;;  %v382_v35 = vld [vmem:[#allocation7 + $0xb0] sm:$0xff]  ;;  %v385_v36 = vld [vmem:[#allocation7 + $0xc8] sm:$0xff]  ;;  %v387_v37 = vld [vmem:[#allocation7 + $0xd8] sm:$0xff]  ;;  %p5546_p4 = scmp.lt.s32.totalorder %s6791_s13, %s5544_s6  ;;  %p5547_p7 = scmp.lt.s32.totalorder %s5545_s14, %s5539_s28 }
  0x9e   : > { %4904 = vmatprep.subr.bf16.mxu0 %v4903_v15  ;;  %v4917_v38 = vpack.c.bf16 %v382_v35, %v380_v34  ;;  %v4919_v39 = vpack.c.bf16 %v387_v37, %v385_v36  ;;  %v384_v40 = vld [vmem:[#allocation7 + $0xc0] sm:$0xff]  ;;  %v386_v41 = vld [vmem:[#allocation7 + $0xd0] sm:$0xff]  ;;  %v389_v42 = vld [vmem:[#allocation7 + $0xe8] sm:$0xff]  ;;  %p5542_p10 = pneg %p5541_p6 }
  0x9f   : > { %v391_v43 = vld [vmem:[#allocation7 + $0xf8] sm:$0xff]  ;;  %v4921_v44 = vpack.c.bf16 %v386_v41, %v384_v40  ;;  %v388_v46 = vld [vmem:[#allocation7 + $0xe0] sm:$0xff]  ;;  %v390_v47 = vld [vmem:[#allocation7 + $0xf0] sm:$0xff]  ;;  %p5548_p3 = por %p5547_p7, %p5546_p4 }
  0xa0   : > { %v4923_v45 = vpack.c.bf16 %v391_v43, %v389_v42  ;;  %v4925_v48 = vpack.c.bf16 %v390_v47, %v388_v46  ;;  %v312_v49 = vld [vmem:[%s5887_s30] sm:$0xff]  ;;  %v313_v50 = vld [vmem:[%s5887_s30 + $0x8] sm:$0xff]  ;;  %v314_v51 = vld [vmem:[%s5887_s30 + $0x10] sm:$0xff] }
  0xa1   : > { %4906 = vmatpush1.bf16.msra.mxu0 %v4905_v20  ;;  %v315_v52 = vld [vmem:[%s5887_s30 + $0x18] sm:$0xff]  ;;  %v316_v53 = vld [vmem:[%s5887_s30 + $0x20] sm:$0xff]  ;;  %v317_v54 = vld [vmem:[%s5887_s30 + $0x28] sm:$0xff]  ;;  %p5549_p5 = pnand %p5548_p3, %p5542_p10 }
  0xa2   : > { %4908 = vmatprep.subr.bf16.mxu0 %v4907_v21  ;;  %v318_v55 = vld [vmem:[%s5887_s30 + $0x30] sm:$0xff]  ;;  %v319_v56 = vld [vmem:[%s5887_s30 + $0x38] sm:$0xff]  ;;  %v320_v57 = vld [vmem:[%s5887_s30 + $0x40] sm:$0xff] }
  0xa3   : > { %v321_v58 = vld [vmem:[%s5887_s30 + $0x48] sm:$0xff]  ;;  %v322_v59 = vld [vmem:[%s5887_s30 + $0x50] sm:$0xff]  ;;  %v323_v60 = vld [vmem:[%s5887_s30 + $0x58] sm:$0xff] }
  0xa4   : > { %v324_v61 = vld [vmem:[%s5887_s30 + $0x60] sm:$0xff]  ;;  %v325_v62 = vld [vmem:[%s5887_s30 + $0x68] sm:$0xff]  ;;  %v326_v63 = vld [vmem:[%s5887_s30 + $0x70] sm:$0xff] }
  0xa5   : > { %4910 = vmatpush1.bf16.msra.mxu0 %v4909_v26  ;;  %v327_v1 = vld [vmem:[%s5887_s30 + $0x78] sm:$0xff]  ;;  %v328_v2 = vld [vmem:[%s5895_s9] sm:$0xff]  ;;  %vm5948_vm1 = vmpackc.low %vm569_vm0, %vm569_vm0 }
  0xa6   : > { %4912 = vmatprep.subr.bf16.mxu0 %v4911_v27  ;;  %v344_v3 = vmul.f32 0.125, %v328_v2  ;;  %v329_v13 = vld [vmem:[%s5895_s9 + $0x8] sm:$0xff]  ;;  %v330_v15 = vld [vmem:[%s5895_s9 + $0x10] sm:$0xff]  ;;  %v331_v26 = vld [vmem:[%s5895_s9 + $0x18] sm:$0xff] }
  0xa7   : > { %v5969_v16 = vmul.f32 0.125, %v329_v13  ;;  %v5971_v18 = vmul.f32 0.125, %v330_v15  ;;  %v332_v27 = vld [vmem:[%s5895_s9 + $0x20] sm:$0xff]  ;;  %v5994_v29 = vmul.f32 0.125, %v331_v26 }
  0xa8   : > { %2091 = vrot.lane.b32.xlu1 %v344_v3, %s5628_s24  ;;  %4595 = vmatprep.mubr.msk.f32.mxu1 %vm569_vm0, %v344_v3 }
  0xa9   : > { %4914 = vmatpush1.bf16.msra.mxu0 %v4913_v32 }
  0xaa   : > { %4916 = vmatprep.subr.bf16.mxu0 %v4915_v33  ;;  %v5998_v33 = vmul.f32 0.125, %v332_v27 }
  0xad   : > { %4918 = vmatpush1.bf16.msra.mxu0 %v4917_v38  ;;  %v333_v38 = vld [vmem:[%s5895_s9 + $0x28] sm:$0xff] }
  0xae   : > { %4920 = vmatprep.subr.bf16.mxu0 %v4919_v39  ;;  %v334_v39 = vld [vmem:[%s5895_s9 + $0x30] sm:$0xff]  ;;  %v6023_v41 = vmul.f32 0.125, %v333_v38 }
  0xb1   : > { %4922 = vmatpush1.bf16.msra.mxu0 %v4921_v44 }
  0xb2   : > { %4924 = vmatprep.subr.bf16.mxu0 %v4923_v45  ;;  %v6031_v45 = vmul.f32 0.125, %v334_v39 }
  0xb5   : > { %4926 = vmatpush1.bf16.msra.mxu0 %v4925_v48 }
  0xb8   : > { %457 = vmatmul.mubr.f32.vlgmr.msra.gmra.mrb[0].mxu0 %v312_v49 }
  0xb9   : > { %462 = vmatprep.mubr.f32.mxu0 %v5627_v0 }
  0xbc   : > { %463 = vmatmul.mubr.f32.gmra.mrb[2].mxu0 %v313_v50  ;;  %v335_v50 = vld [vmem:[%s5895_s9 + $0x38] sm:$0xff] }
  0xbd   : > { %468 = vmatprep.mubr.f32.mxu0 %v5627_v0 }
  0xc0   : > { %469 = vmatmul.mubr.f32.gmra.mrb[4].mxu0 %v314_v51  ;;  %v336_v51 = vld [vmem:[%s5895_s9 + $0x40] sm:$0xff] }
  0xc1   : > { %474 = vmatprep.mubr.f32.mxu0 %v5627_v0 }
  0xc4   : > { %475 = vmatmul.mubr.f32.gmra.mrb[6].mxu0 %v315_v52 }
  0xc5   : > { %480 = vmatprep.mubr.f32.mxu0 %v5627_v0 }
  0xc8   : > { %481 = vmatmul.mubr.f32.gmra.mrb[8].mxu0 %v316_v53  ;;  %v6055_v53 = vmul.f32 0.125, %v335_v50  ;;  %v341_v50 = vld [vmem:[%s5895_s9 + $0x68] sm:$0xff] }
  0xc9   : > { %486 = vmatprep.mubr.f32.mxu0 %v5627_v0 }
  0xcc   : > { %487 = vmatmul.mubr.f32.gmra.mrb[10].mxu0 %v317_v54 }
  0xcd   : > { %492 = vmatprep.mubr.f32.mxu0 %v5627_v0 }
  0xd0   : > { %493 = vmatmul.mubr.f32.gmra.mrb[12].mxu0 %v318_v55 }
  0xd1   : > { %498 = vmatprep.mubr.f32.mxu0 %v5627_v0 }
  0xd4   : > { %499 = vmatmul.mubr.f32.gmra.mrb[14].mxu0 %v319_v56 }
  0xd5   : > { %504 = vmatprep.mubr.f32.mxu0 %v5627_v0 }
  0xd8   : > { %505 = vmatmul.mubr.f32.gmra.mrb[16].mxu0 %v320_v57  ;;  %v6063_v57 = vmul.f32 0.125, %v336_v51  ;;  %v342_v51 = vld [vmem:[%s5895_s9 + $0x70] sm:$0xff] }
  0xd9   : > { %510 = vmatprep.mubr.f32.mxu0 %v5627_v0 }
  0xdc   : > { %511 = vmatmul.mubr.f32.gmra.mrb[18].mxu0 %v321_v58 }
  0xdd   : > { %516 = vmatprep.mubr.f32.mxu0 %v5627_v0 }
  0xe0   : > { %517 = vmatmul.mubr.f32.gmra.mrb[20].mxu0 %v322_v59 }
  0xe1   : > { %522 = vmatprep.mubr.f32.mxu0 %v5627_v0 }
  0xe4   : > { %523 = vmatmul.mubr.f32.gmra.mrb[22].mxu0 %v323_v60 }
  0xe5   : > { %528 = vmatprep.mubr.f32.mxu0 %v5627_v0 }
  0xe8   : > { %529 = vmatmul.mubr.f32.gmra.mrb[24].mxu0 %v324_v61 }
  0xe9   : > { %534 = vmatprep.mubr.f32.mxu0 %v5627_v0 }
  0xec   : > { %535 = vmatmul.mubr.f32.gmra.mrb[26].mxu0 %v325_v62  ;;  %v337_v62 = vld [vmem:[%s5895_s9 + $0x48] sm:$0xff] }
  0xed   : > { %540 = vmatprep.mubr.f32.mxu0 %v5627_v0  ;;  %v6087_v2 = vmul.f32 0.125, %v337_v62  ;;  %v6151_v62 = vmul.f32 0.125, %v341_v50  ;;  %v343_v50 = vld [vmem:[%s5895_s9 + $0x78] sm:$0xff] }
  0xf0   : > { %541 = vmatmul.mubr.f32.gmra.mrb[28].mxu0 %v326_v63  ;;  %v338_v63 = vld [vmem:[%s5895_s9 + $0x50] sm:$0xff] }
  0xf1   : > { %546 = vmatprep.mubr.f32.mxu0 %v5627_v0  ;;  %v6883_v0 = vmov 0 }
  0xf2   : > { %v6884_v0 = vsel %vm5948_vm1, 4294967295, %v6883_v0 }
  0xf3   : > { %6885 = vst [vmem:[#allocation16_spill] sm:$0xff] %v6884_v0 }
  0xf4   : > { %547 = vmatmul.mubr.f32.gmra.mrb[30].mxu0 %v327_v1 }
 0x18b   : > { %v458_v4 = vpop.f32.mrb[0].mxu0 }
 0x18c   : > { %v5944_v5 = vpop.f32.mrb[1].mxu0 }
 0x18f   : > { %v464_v6 = vpop.f32.mrb[2].mxu0 }
 0x190   : > { %v5952_v7 = vpop.f32.mrb[3].mxu0  ;;  %v5215_v8 = vpack.i.bf16 %v464_v6, %v458_v4  ;;  %v4927_v9 = vpack.c.bf16 %v464_v6, %v458_v4 }
 0x191   : > { %v5958_v11 = vpack.c.bf16 %v5952_v7, %v5944_v5 }
 0x192   : > { %5216 = vrot.lane.b32.xlu0 %v5215_v8, %s5628_s24  ;;  %4929 = vmatprep.subr.msk.bf16.mxu1 %vm5948_vm1, %v4927_v9  ;;  %v6095_v8 = vmul.f32 0.125, %v338_v63 }
 0x193   : > { %v470_v12 = vpop.f32.mrb[4].mxu0  ;;  %4932 = vmatpush3.bf16.xpose.msk.msra.mxu1 %vm5948_vm1, %v4927_v9 }
 0x194   : > { %v5966_v14 = vpop.f32.mrb[5].mxu0 }
 0x197   : > { %v476_v17 = vpop.f32.mrb[6].mxu0 }
 0x198   : > { %v5220_v19 = vpack.i.bf16 %v476_v17, %v470_v12  ;;  %v4933_v20 = vpack.c.bf16 %v476_v17, %v470_v12  ;;  %v5973_v21 = vpop.f32.mrb[7].mxu0  ;;  %v339_v17 = vld [vmem:[%s5895_s9 + $0x58] sm:$0xff] }
 0x199   : > { %v5979_v23 = vpack.c.bf16 %v5973_v21, %v5966_v14 }
 0x19a   : > { %4596 = vmatmul.mubr.msk.f32.vlgmr.msra.gmra.mrb[0].mxu1 %vm569_vm0, %v5969_v16  ;;  %5221 = vrot.lane.b32.xlu1 %v5220_v19, %s5628_s24  ;;  %v340_v19 = vld [vmem:[%s5895_s9 + $0x60] sm:$0xff] }
 0x19b   : > { %4935 = vmatprep.subr.msk.bf16.mxu1 %vm5948_vm1, %v4933_v20  ;;  %v482_v24 = vpop.f32.mrb[8].mxu0  ;;  %4602 = vmatprep.mubr.msk.f32.mxu1 %vm569_vm0, %v5971_v18 }
 0x19c   : > { %4938 = vmatpush3.bf16.xpose.msk.msra.mxu1 %vm5948_vm1, %v4933_v20  ;;  %v5990_v25 = vpop.f32.mrb[9].mxu0 }
 0x19f   : > { %v488_v28 = vpop.f32.mrb[10].mxu0 }
 0x1a0   : > { %v5225_v30 = vpack.i.bf16 %v488_v28, %v482_v24  ;;  %v4939_v31 = vpack.c.bf16 %v488_v28, %v482_v24  ;;  %v5996_v32 = vpop.f32.mrb[11].mxu0  ;;  %v6119_v24 = vmul.f32 0.125, %v339_v17  ;;  %v6157_v17 = vmul.f32 0.125, %v342_v51 }
 0x1a1   : > { %v6004_v35 = vpack.c.bf16 %v5996_v32, %v5990_v25  ;;  %v6175_v51 = vmul.f32 0.125, %v343_v50 }
 0x1a2   : > { %5226 = vrot.lane.b32.xlu1 %v5225_v30, %s5628_s24  ;;  %4941 = vmatprep.subr.msk.bf16.mxu1 %vm5948_vm1, %v4939_v31  ;;  %v6127_v30 = vmul.f32 0.125, %v340_v19 }
 0x1a3   : > { %4603 = vmatmul.mubr.msk.f32.vlgmr.msra.gmra.mrb[2].mxu1 %vm569_vm0, %v5994_v29  ;;  %v6011_v36 = vpop.f32.mrb[12].mxu0 }
 0x1a4   : > { %4944 = vmatpush3.bf16.xpose.msk.msra.mxu1 %vm5948_vm1, %v4939_v31  ;;  %v6015_v37 = vpop.f32.mrb[13].mxu0  ;;  %4609 = vmatprep.mubr.msk.f32.mxu1 %vm569_vm0, %v5998_v33 }
 0x1a7   : > { %v6021_v40 = vpop.f32.mrb[14].mxu0 }
 0x1a8   : > { %v4945_v43 = vpack.c.bf16 %v6021_v40, %v6011_v36  ;;  %v6029_v44 = vpop.f32.mrb[15].mxu0 }
 0x1a9   : > { %v6037_v47 = vpack.c.bf16 %v6029_v44, %v6015_v37 }
 0x1aa   : > { %4947 = vmatprep.subr.msk.bf16.mxu1 %vm5948_vm1, %v4945_v43 }
 0x1ab   : > { %4610 = vmatmul.mubr.msk.f32.vlgmr.msra.gmra.mrb[4].mxu1 %vm569_vm0, %v6023_v41  ;;  %v6043_v48 = vpop.f32.mrb[16].mxu0 }
 0x1ac   : > { %4950 = vmatpush3.bf16.xpose.msk.msra.mxu1 %vm5948_vm1, %v4945_v43  ;;  %v6047_v49 = vpop.f32.mrb[17].mxu0  ;;  %4616 = vmatprep.mubr.msk.f32.mxu1 %vm569_vm0, %v6031_v45 }
 0x1ad   : > { %6886 = vst [vmem:[#allocation17_spill] sm:$0xff] %v6047_v49 }
 0x1af   : > { %v6053_v52 = vpop.f32.mrb[18].mxu0 }
 0x1b0   : > { %v4951_v55 = vpack.c.bf16 %v6053_v52, %v6043_v48  ;;  %v6061_v56 = vpop.f32.mrb[19].mxu0 }
 0x1b1   : > { %6887 = vst [vmem:[#allocation18_spill] sm:$0xff] %v6061_v56  ;;  %v6069_v59 = vpack.c.bf16 %v6061_v56, %v6047_v49 }
 0x1b2   : > { %4953 = vmatprep.subr.msk.bf16.mxu1 %vm5948_vm1, %v4951_v55 }
 0x1b3   : > { %6888 = vst [vmem:[#allocation19_spill] sm:$0xff] %v6069_v59  ;;  %4617 = vmatmul.mubr.msk.f32.vlgmr.msra.gmra.mrb[6].mxu1 %vm569_vm0, %v6055_v53  ;;  %v6075_v60 = vpop.f32.mrb[20].mxu0 }
 0x1b4   : > { %4956 = vmatpush3.bf16.xpose.msk.msra.mxu1 %vm5948_vm1, %v4951_v55  ;;  %v6079_v61 = vpop.f32.mrb[21].mxu0  ;;  %4623 = vmatprep.mubr.msk.f32.mxu1 %vm569_vm0, %v6063_v57 }
 0x1b5   : > { %6889 = vst [vmem:[#allocation20_spill] sm:$0xff] %v6079_v61 }
 0x1b7   : > { %v6085_v1 = vpop.f32.mrb[22].mxu0 }
 0x1b8   : > { %v4957_v4 = vpack.c.bf16 %v6085_v1, %v6075_v60  ;;  %v6093_v6 = vpop.f32.mrb[23].mxu0 }
 0x1b9   : > { %6890 = vst [vmem:[#allocation21_spill] sm:$0xff] %v6093_v6  ;;  %v6101_v12 = vpack.c.bf16 %v6093_v6, %v6079_v61 }
 0x1ba   : > { %4959 = vmatprep.subr.msk.bf16.mxu1 %vm5948_vm1, %v4957_v4 }
 0x1bb   : > { %6891 = vst [vmem:[#allocation22_spill] sm:$0xff] %v6101_v12  ;;  %4624 = vmatmul.mubr.msk.f32.vlgmr.msra.gmra.mrb[8].mxu1 %vm569_vm0, %v6087_v2  ;;  %v6107_v13 = vpop.f32.mrb[24].mxu0 }
 0x1bc   : > { %4962 = vmatpush3.bf16.xpose.msk.msra.mxu1 %vm5948_vm1, %v4957_v4  ;;  %v6111_v15 = vpop.f32.mrb[25].mxu0  ;;  %4630 = vmatprep.mubr.msk.f32.mxu1 %vm569_vm0, %v6095_v8 }
 0x1bd   : > { %6892 = vst [vmem:[#allocation23_spill] sm:$0xff] %v6111_v15 }
 0x1bf   : > { %v6117_v20 = vpop.f32.mrb[26].mxu0 }
 0x1c0   : > { %v4963_v27 = vpack.c.bf16 %v6117_v20, %v6107_v13  ;;  %v6125_v28 = vpop.f32.mrb[27].mxu0 }
 0x1c1   : > { %6893 = vst [vmem:[#allocation24_spill] sm:$0xff] %v6125_v28  ;;  %v6133_v38 = vpack.c.bf16 %v6125_v28, %v6111_v15 }
 0x1c2   : > { %4965 = vmatprep.subr.msk.bf16.mxu1 %vm5948_vm1, %v4963_v27 }
 0x1c3   : > { %6894 = vst [vmem:[#allocation25_spill] sm:$0xff] %v6133_v38  ;;  %4631 = vmatmul.mubr.msk.f32.vlgmr.msra.gmra.mrb[10].mxu1 %vm569_vm0, %v6119_v24  ;;  %v6139_v39 = vpop.f32.mrb[28].mxu0 }
 0x1c4   : > { %4968 = vmatpush3.bf16.xpose.msk.msra.mxu1 %vm5948_vm1, %v4963_v27  ;;  %v6143_v43 = vpop.f32.mrb[29].mxu0  ;;  %4637 = vmatprep.mubr.msk.f32.mxu1 %vm569_vm0, %v6127_v30  ;;  %v6181_v27 = vpop.permute.xlu1 %2091 }
 0x1c5   : > { %6895 = vst [vmem:[#allocation26_spill] sm:$0xff] %v6143_v43  ;;  %6897 = vst [vmem:[#allocation28_spill] sm:$0xff] %v6181_v27 }
 0x1c7   : > { %v6149_v55 = vpop.f32.mrb[30].mxu0 }
 0x1c8   : > { %v4969_v4 = vpack.c.bf16 %v6149_v55, %v6139_v39  ;;  %v6159_v19 = vpop.f32.mrb[31].mxu0 }
 0x1c9   : > { %6896 = vst [vmem:[#allocation27_spill] sm:$0xff] %v6159_v19  ;;  %v5003_v31 = vpack.c.bf16 %v6159_v19, %v6143_v43 }
 0x1ca   : > { %4971 = vmatprep.subr.msk.bf16.mxu1 %vm5948_vm1, %v4969_v4 }
 0x1cb   : > { %4638 = vmatmul.mubr.msk.f32.vlgmr.msra.gmra.mrb[12].mxu1 %vm569_vm0, %v6151_v62  ;;  %5004 = vmatprep.subr.bf16.mxu0 %v5003_v31 }
 0x1cc   : > { %4974 = vmatpush3.bf16.xpose.msk.msra.mxu1 %vm5948_vm1, %v4969_v4  ;;  %4644 = vmatprep.mubr.msk.f32.mxu1 %vm569_vm0, %v6157_v17 }
 0x1cd   : > { %4976 = vmatprep.subr.bf16.mxu1 %v5958_v11  ;;  %5006 = vmatpush3.bf16.msra.mxu0 %v5003_v31 }
 0x1d3   : > { %4645 = vmatmul.mubr.msk.f32.vlgmr.msra.gmra.mrb[14].mxu1 %vm569_vm0, %v6175_v51 }
 0x1d4   : > { %4978 = vmatpush3.bf16.msra.mxu1 %v5958_v11 }
 0x1d5   : > { %4980 = vmatprep.subr.bf16.mxu1 %v5979_v23 }
 0x20c   : > { %v5222_v58 = vpop.permute.xlu1 %5221 }
 0x20d   : > { %v5224_v4 = vunpack.i.h.bf16 %v5222_v58  ;;  %v5223_v9 = vunpack.i.l.bf16 %v5222_v58 }
 0x20f   : > { %v6183_v34 = vpack.c.bf16 %v5224_v4, %v5223_v9 }
 0x211   : > { %6898 = vst [vmem:[#allocation29_spill] sm:$0xff] %v6183_v34  ;;  %5015 = vmatprep.subr.msk.bf16.mxu0 %vm5948_vm1, %v6183_v34 }
 0x214   : > { %v6248_v0 = vpop.permute.xlu1 %5226 }
 0x26d   : > { %v4597_v31 = vpop.f32.mrb[0].mxu1 }
 0x26e   : > { %v648_v50 = vpop.f32.mrb[1].mxu1  ;;  %v1270_v10 = vsel %vm1266_vm2, %v4597_v31, -inf }
 0x26f   : > { %1271 = vmax.xlane.f32.xlu0 %v1270_v10  ;;  %v1267_v11 = vsel %vm1266_vm2, %v648_v50, -inf }
 0x273   : > { %1268 = vmax.xlane.f32.xlu0 %v1267_v11 }
 0x276   : > { %v4604_v46 = vpop.f32.mrb[2].mxu1 }
 0x277   : > { %v735_v22 = vpop.f32.mrb[3].mxu1  ;;  %v1276_v26 = vsel %vm1266_vm2, %v4604_v46, -inf }
 0x278   : > { %1277 = vmax.xlane.f32.xlu1 %v1276_v26  ;;  %v1273_v58 = vsel %vm1266_vm2, %v735_v22, -inf }
 0x27c   : > { %1274 = vmax.xlane.f32.xlu1 %v1273_v58 }
 0x27e   : > { %v6192_v9 = vpop.f32.mrb[4].mxu1 }
 0x27f   : > { %v6194_v4 = vpop.f32.mrb[5].mxu1  ;;  %v1282_v63 = vsel %vm1266_vm2, %v6192_v9, -inf }
 0x280   : > { %1283 = vmax.xlane.f32.xlu1 %v1282_v63  ;;  %v1279_v10 = vsel %vm1266_vm2, %v6194_v4, -inf }
 0x281   : > { %1280 = vmax.xlane.f32.xlu0 %v1279_v10 }
 0x286   : > { %v6200_v11 = vpop.f32.mrb[6].mxu1 }
 0x287   : > { %v6202_v54 = vpop.f32.mrb[7].mxu1  ;;  %v1288_v26 = vsel %vm1266_vm2, %v6200_v11, -inf }
 0x288   : > { %1289 = vmax.xlane.f32.xlu1 %v1288_v26  ;;  %v1285_v58 = vsel %vm1266_vm2, %v6202_v54, -inf }
 0x289   : > { %1286 = vmax.xlane.f32.xlu0 %v1285_v58 }
 0x28e   : > { %v6208_v3 = vpop.f32.mrb[8].mxu1 }
 0x28f   : > { %v6210_v42 = vpop.f32.mrb[9].mxu1  ;;  %v1294_v63 = vsel %vm1266_vm2, %v6208_v3, -inf }
 0x290   : > { %1295 = vmax.xlane.f32.xlu1 %v1294_v63  ;;  %v1291_v10 = vsel %vm1266_vm2, %v6210_v42, -inf }
 0x291   : > { %1292 = vmax.xlane.f32.xlu0 %v1291_v10 }
 0x296   : > { %v6216_v15 = vpop.f32.mrb[10].mxu1 }
 0x297   : > { %v6218_v28 = vpop.f32.mrb[11].mxu1  ;;  %v1300_v26 = vsel %vm1266_vm2, %v6216_v15, -inf }
 0x298   : > { %1301 = vmax.xlane.f32.xlu1 %v1300_v26  ;;  %v1297_v58 = vsel %vm1266_vm2, %v6218_v28, -inf }
 0x299   : > { %1298 = vmax.xlane.f32.xlu0 %v1297_v58 }
 0x29e   : > { %v6224_v43 = vpop.f32.mrb[12].mxu1 }
 0x29f   : > { %v6226_v19 = vpop.f32.mrb[13].mxu1  ;;  %v1306_v63 = vsel %vm1266_vm2, %v6224_v43, -inf }
 0x2a0   : > { %1307 = vmax.xlane.f32.xlu1 %v1306_v63  ;;  %v1303_v10 = vsel %vm1266_vm2, %v6226_v19, -inf  ;;  %v6899_v63 = vpack.i.bf16 %v6021_v40, %v6011_v36 }
 0x2a1   : > { %1304 = vmax.xlane.f32.xlu0 %v1303_v10  ;;  %v6246_v10 = vpop.permute.xlu0 %5216 }
 0x2a6   : > { %v6232_v49 = vpop.f32.mrb[14].mxu1 }
 0x2a7   : > { %v6234_v56 = vpop.f32.mrb[15].mxu1  ;;  %v1312_v26 = vsel %vm1266_vm2, %v6232_v49, -inf }
 0x2a8   : > { %1313 = vmax.xlane.f32.xlu1 %v1312_v26  ;;  %v1309_v58 = vsel %vm1266_vm2, %v6234_v56, -inf }
 0x2a9   : > { %1310 = vmax.xlane.f32.xlu0 %v1309_v58 }
 0x2b9   : > { %5231 = vrot.lane.b32.xlu1 %v6899_v63, %s5628_s24 }
 0x2bf   : > { %2093 = vrot.lane.b32.xlu0 %v5969_v16, %s5628_s24 }
 0x2fc   : > { %v1272_v61 = vpop.xlane.xlu0 %1271 }
 0x2fd   : > { %v1316_v6 = vsub.f32 %v4597_v31, %v1272_v61 }
 0x2ff   : > { %v1333_v34 = vmul.f32 1.442695, %v1316_v6 }
 0x300   : > { %v1269_v27 = vpop.xlane.xlu0 %1268 }
 0x301   : > { %5295 = vpow2.f32 %v1333_v34  ;;  %v1315_v26 = vsub.f32 %v648_v50, %v1269_v27 }
 0x303   : > { %v1331_v38 = vmul.f32 1.442695, %v1315_v26 }
 0x305   : > { %5297 = vpow2.f32 %v1331_v38  ;;  %v1278_v58 = vpop.xlane.xlu1 %1277 }
 0x306   : > { %v1318_v12 = vsub.f32 %v4604_v46, %v1278_v58 }
 0x308   : > { %v1337_v59 = vmul.f32 1.442695, %v1318_v12 }
 0x309   : > { %v1275_v36 = vpop.xlane.xlu1 %1274 }
 0x30a   : > { %5299 = vpow2.f32 %v1337_v59  ;;  %v1317_v40 = vsub.f32 %v735_v22, %v1275_v36 }
 0x30b   : > { %v6250_v63 = vpop.eup %5295 }
 0x30c   : > { %v1335_v16 = vmul.f32 1.442695, %v1317_v40  ;;  %v1366_v61 = vsel %vm1266_vm2, %v6250_v63, 0.0 }
 0x30d   : > { %v1284_v6 = vpop.xlane.xlu1 %1283  ;;  %1367 = vadd.xlane.f32.xlu1 %v1366_v61 }
 0x30e   : > { %5301 = vpow2.f32 %v1335_v16  ;;  %v1320_v34 = vsub.f32 %v6192_v9, %v1284_v6  ;;  %v1281_v27 = vpop.xlane.xlu0 %1280 }
 0x30f   : > { %v6255_v31 = vpop.eup %5297  ;;  %v1319_v46 = vsub.f32 %v6194_v4, %v1281_v27 }
 0x310   : > { %v1341_v12 = vmul.f32 1.442695, %v1320_v34  ;;  %v1363_v22 = vsel %vm1266_vm2, %v6255_v31, 0.0 }
 0x311   : > { %v1339_v59 = vmul.f32 1.442695, %v1319_v46  ;;  %1364 = vadd.xlane.f32.xlu0 %v1363_v22 }
 0x312   : > { %5303 = vpow2.f32 %v1341_v12 }
 0x313   : > { %5305 = vpow2.f32 %v1339_v59 }
 0x314   : > { %v6260_v38 = vpop.eup %5299 }
 0x315   : > { %v1290_v50 = vpop.xlane.xlu1 %1289  ;;  %v1372_v26 = vsel %vm1266_vm2, %v6260_v38, 0.0 }
 0x316   : > { %v1322_v9 = vsub.f32 %v6200_v11, %v1290_v50  ;;  %v1287_v58 = vpop.xlane.xlu0 %1286  ;;  %1373 = vadd.xlane.f32.xlu1 %v1372_v26 }
 0x317   : > { %v1321_v4 = vsub.f32 %v6202_v54, %v1287_v58 }
 0x318   : > { %v6266_v36 = vpop.eup %5301  ;;  %v1345_v40 = vmul.f32 1.442695, %v1322_v9 }
 0x319   : > { %v1343_v16 = vmul.f32 1.442695, %v1321_v4  ;;  %v1369_v61 = vsel %vm1266_vm2, %v6266_v36, 0.0 }
 0x31a   : > { %5307 = vpow2.f32 %v1345_v40  ;;  %1370 = vadd.xlane.f32.xlu0 %v1369_v61 }
 0x31b   : > { %5309 = vpow2.f32 %v1343_v16 }
 0x31c   : > { %v6270_v6 = vpop.eup %5303 }
 0x31d   : > { %v6272_v34 = vpop.eup %5305  ;;  %v1296_v27 = vpop.xlane.xlu1 %1295  ;;  %v1378_v11 = vsel %vm1266_vm2, %v6270_v6, 0.0 }
 0x31e   : > { %v1324_v54 = vsub.f32 %v6208_v3, %v1296_v27  ;;  %v1293_v46 = vpop.xlane.xlu0 %1292  ;;  %1379 = vadd.xlane.f32.xlu1 %v1378_v11  ;;  %v1375_v12 = vsel %vm1266_vm2, %v6272_v34, 0.0 }
 0x31f   : > { %v1323_v22 = vsub.f32 %v6210_v42, %v1293_v46  ;;  %1376 = vadd.xlane.f32.xlu0 %v1375_v12 }
 0x320   : > { %v1349_v59 = vmul.f32 1.442695, %v1324_v54 }
 0x321   : > { %v1347_v50 = vmul.f32 1.442695, %v1323_v22 }
 0x322   : > { %5311 = vpow2.f32 %v1349_v59 }
 0x323   : > { %5313 = vpow2.f32 %v1347_v50 }
 0x324   : > { %v6280_v26 = vpop.eup %5307 }
 0x325   : > { %v6282_v9 = vpop.eup %5309  ;;  %v1302_v58 = vpop.xlane.xlu1 %1301  ;;  %v1384_v3 = vsel %vm1266_vm2, %v6280_v26, 0.0 }
 0x326   : > { %v1326_v4 = vsub.f32 %v6216_v15, %v1302_v58  ;;  %v1299_v40 = vpop.xlane.xlu0 %1298  ;;  %1385 = vadd.xlane.f32.xlu1 %v1384_v3  ;;  %v1381_v42 = vsel %vm1266_vm2, %v6282_v9, 0.0 }
 0x327   : > { %v1325_v16 = vsub.f32 %v6218_v28, %v1299_v40  ;;  %1382 = vadd.xlane.f32.xlu0 %v1381_v42 }
 0x328   : > { %v1353_v61 = vmul.f32 1.442695, %v1326_v4 }
 0x329   : > { %v1351_v27 = vmul.f32 1.442695, %v1325_v16 }
 0x32a   : > { %5315 = vpow2.f32 %v1353_v61 }
 0x32b   : > { %5317 = vpow2.f32 %v1351_v27 }
 0x32c   : > { %v6290_v11 = vpop.eup %5311 }
 0x32d   : > { %v6292_v54 = vpop.eup %5313  ;;  %v1390_v46 = vsel %vm1266_vm2, %v6290_v11, 0.0  ;;  %v1308_v50 = vpop.xlane.xlu1 %1307 }
 0x32e   : > { %1391 = vadd.xlane.f32.xlu1 %v1390_v46  ;;  %v1387_v15 = vsel %vm1266_vm2, %v6292_v54, 0.0  ;;  %v1305_v58 = vpop.xlane.xlu0 %1304  ;;  %v1328_v3 = vsub.f32 %v6224_v43, %v1308_v50 }
 0x32f   : > { %1388 = vadd.xlane.f32.xlu0 %v1387_v15  ;;  %v1327_v4 = vsub.f32 %v6226_v19, %v1305_v58  ;;  %v6900_v58 = vpack.i.bf16 %v6085_v1, %v6075_v60  ;;  %v6905_v1 = vpack.i.bf16 %v6029_v44, %v6015_v37 }
 0x330   : > { %v1357_v16 = vmul.f32 1.442695, %v1328_v3  ;;  %v6901_v3 = vpack.i.bf16 %v6053_v52, %v6043_v48  ;;  %v6903_v48 = vpack.i.bf16 %v6117_v20, %v6107_v13 }
 0x331   : > { %v1355_v27 = vmul.f32 1.442695, %v1327_v4 }
 0x332   : > { %5319 = vpow2.f32 %v1357_v16 }
 0x333   : > { %5321 = vpow2.f32 %v1355_v27 }
 0x334   : > { %v6298_v12 = vpop.eup %5315 }
 0x335   : > { %v6300_v28 = vpop.eup %5317  ;;  %v1396_v22 = vsel %vm1266_vm2, %v6298_v12, 0.0  ;;  %v1314_v40 = vpop.xlane.xlu1 %1313 }
 0x336   : > { %1397 = vadd.xlane.f32.xlu1 %v1396_v22  ;;  %v1393_v59 = vsel %vm1266_vm2, %v6300_v28, 0.0  ;;  %v1311_v42 = vpop.xlane.xlu0 %1310  ;;  %v1330_v61 = vsub.f32 %v6232_v49, %v1314_v40 }
 0x337   : > { %1394 = vadd.xlane.f32.xlu0 %v1393_v59  ;;  %v1329_v46 = vsub.f32 %v6234_v56, %v1311_v42 }
 0x338   : > { %v1361_v15 = vmul.f32 1.442695, %v1330_v61 }
 0x33a   : > { %5323 = vpow2.f32 %v1361_v15  ;;  %v5218_v15 = vunpack.i.l.bf16 %v6246_v10 }
 0x347   : > { %2184 = vrot.lane.b32.xlu1 %v5994_v29, %s5628_s24  ;;  %v1359_v29 = vmul.f32 1.442695, %v1329_v46  ;;  %v5219_v46 = vunpack.i.h.bf16 %v6246_v10 }
 0x349   : > { %5325 = vpow2.f32 %v1359_v29 }
 0x34d   : > { %2182 = vrot.lane.b32.xlu0 %v5971_v18, %s5628_s24  ;;  %v6314_v18 = vpop.eup %5319 }
 0x34e   : > { %v6316_v22 = vpop.eup %5321  ;;  %v1402_v43 = vsel %vm1266_vm2, %v6314_v18, 0.0 }
 0x34f   : > { %v6320_v19 = vpop.eup %5323  ;;  %v1399_v49 = vsel %vm1266_vm2, %v6316_v22, 0.0 }
 0x350   : > { %v1408_v59 = vsel %vm1266_vm2, %v6320_v19, 0.0 }
 0x353   : > { %v6324_v56 = vpop.eup %5325 }
 0x354   : > { %v1405_v50 = vsel %vm1266_vm2, %v6324_v56, 0.0 }
 0x36b   : > { %1403 = vadd.xlane.f32.xlu1 %v1402_v43 }
 0x36c   : > { %1400 = vadd.xlane.f32.xlu0 %v1399_v49 }
 0x36f   : > { %1409 = vadd.xlane.f32.xlu1 %v1408_v59 }
 0x370   : > { %1406 = vadd.xlane.f32.xlu0 %v1405_v50 }
 0x380   : > { %2273 = vrot.lane.b32.xlu1 %v5998_v33, %s5628_s24  ;;  %v6902_v33 = vpack.i.bf16 %v6149_v55, %v6139_v39 }
 0x384   : > { %5241 = vrot.lane.b32.xlu1 %v6900_v58, %s5628_s24 }
 0x386   : > { %5236 = vrot.lane.b32.xlu0 %v6901_v3, %s5628_s24 }
 0x388   : > { %2366 = vrot.lane.b32.xlu1 %v6055_v53, %s5628_s24 }
 0x38a   : > { %2275 = vrot.lane.b32.xlu0 %v6023_v41, %s5628_s24  ;;  %v6360_v41 = vpop.permute.xlu1 %5231 }
 0x38c   : > { %2455 = vrot.lane.b32.xlu1 %v6063_v57, %s5628_s24  ;;  %v6904_v57 = vpack.i.bf16 %v5973_v21, %v5966_v14  ;;  %v6907_v21 = vpack.i.bf16 %v5996_v32, %v5990_v25 }
 0x38e   : > { %2364 = vrot.lane.b32.xlu0 %v6031_v45, %s5628_s24  ;;  %v6364_v45 = vpop.permute.xlu0 %2093 }
 0x390   : > { %5251 = vrot.lane.b32.xlu1 %v6902_v33, %s5628_s24 }
 0x392   : > { %5246 = vrot.lane.b32.xlu0 %v6903_v48, %s5628_s24 }
 0x394   : > { %2548 = vrot.lane.b32.xlu1 %v6119_v24, %s5628_s24 }
 0x396   : > { %2457 = vrot.lane.b32.xlu0 %v6087_v2, %s5628_s24  ;;  %v6906_v2 = vpack.i.bf16 %v5952_v7, %v5944_v5 }
 0x398   : > { %2639 = vrot.lane.b32.xlu1 %v6151_v62, %s5628_s24 }
 0x39a   : > { %2546 = vrot.lane.b32.xlu0 %v6095_v8, %s5628_s24  ;;  %v1368_v52 = vpop.xlane.xlu1 %1367 }
 0x39b   : > { %5327 = vrcp.f32 %v1368_v52  ;;  %v5229_v52 = vunpack.i.h.bf16 %v6248_v0 }
 0x39c   : > { %2730 = vrot.lane.b32.xlu1 %v6175_v51, %s5628_s24 }
 0x39e   : > { %2637 = vrot.lane.b32.xlu0 %v6127_v30, %s5628_s24  ;;  %v1365_v53 = vpop.xlane.xlu0 %1364 }
 0x39f   : > { %5329 = vrcp.f32 %v1365_v53  ;;  %v5228_v53 = vunpack.i.l.bf16 %v6248_v0  ;;  %v6912_v0 = vld [vmem:[#allocation28_spill] sm:$0xff] }
 0x3a0   : > { %5261 = vrot.lane.b32.xlu1 %v6904_v57, %s5628_s24 }
 0x3a2   : > { %2728 = vrot.lane.b32.xlu0 %v6157_v17, %s5628_s24 }
 0x3a3   : > { %v1374_v60 = vpop.xlane.xlu1 %1373 }
 0x3a4   : > { %5271 = vrot.lane.b32.xlu1 %v6905_v1, %s5628_s24  ;;  %5331 = vrcp.f32 %v1374_v60 }
 0x3a5   : > { %v5328_v13 = vpop.eup %5327 }
 0x3a6   : > { %5256 = vrot.lane.b32.xlu0 %v6906_v2, %s5628_s24  ;;  %v1428_v37 = vmul.f32 %v5328_v13, %v6250_v63 }
 0x3a7   : > { %v1371_v8 = vpop.xlane.xlu0 %1370 }
 0x3a8   : > { %5333 = vrcp.f32 %v1371_v8 }
 0x3a9   : > { %v5330_v14 = vpop.eup %5329 }
 0x3aa   : > { %5266 = vrot.lane.b32.xlu0 %v6907_v21, %s5628_s24  ;;  %v1427_v20 = vmul.f32 %v5330_v14, %v6255_v31  ;;  %v6908_v31 = vld [vmem:[#allocation19_spill] sm:$0xff]  ;;  %v5019_v14 = vpack.c.bf16 %v5229_v52, %v5228_v53  ;;  %v5234_v21 = vunpack.i.h.bf16 %v6360_v41 }
 0x3ab   : > { %v1380_v44 = vpop.xlane.xlu1 %1379 }
 0x3ac   : > { %5335 = vrcp.f32 %v1380_v44  ;;  %v1377_v24 = vpop.xlane.xlu0 %1376  ;;  %4651 = vmatprep.mubr.msk.f32.mxu1 %vm1266_vm2, %v1427_v20  ;;  %v5233_v20 = vunpack.i.l.bf16 %v6360_v41 }
 0x3ad   : > { %5337 = vrcp.f32 %v1377_v24  ;;  %4652 = vmatmul.mubr.msk.f32.vlgmr.msra.gmra.mrb[16].mxu1 %vm1266_vm2, %v1428_v37 }
 0x3ae   : > { %4982 = vmatpush3.bf16.msra.mxu1 %v5979_v23  ;;  %v5332_v5 = vpop.eup %5331  ;;  %v5025_v41 = vpack.c.bf16 %v5234_v21, %v5233_v20 }
 0x3af   : > { %4984 = vmatprep.subr.bf16.mxu1 %v6004_v35  ;;  %v1430_v30 = vmul.f32 %v5332_v5, %v6260_v38 }
 0x3b2   : > { %v5334_v7 = vpop.eup %5333 }
 0x3b3   : > { %v1386_v25 = vpop.xlane.xlu1 %1385  ;;  %v1429_v32 = vmul.f32 %v5334_v7, %v6266_v36 }
 0x3b4   : > { %5339 = vrcp.f32 %v1386_v25  ;;  %v1383_v39 = vpop.xlane.xlu0 %1382  ;;  %v6913_v25 = vld [vmem:[#allocation29_spill] sm:$0xff] }
 0x3b5   : > { %5341 = vrcp.f32 %v1383_v39  ;;  %4658 = vmatprep.mubr.msk.f32.mxu1 %vm1266_vm2, %v1429_v32 }
 0x3b6   : > { %v5336_v55 = vpop.eup %5335  ;;  %4659 = vmatmul.mubr.msk.f32.vlgmr.msra.gmra.mrb[18].mxu1 %vm1266_vm2, %v1430_v30 }
 0x3b7   : > { %v5338_v62 = vpop.eup %5337  ;;  %4986 = vmatpush3.bf16.msra.mxu1 %v6004_v35  ;;  %v1432_v17 = vmul.f32 %v5336_v55, %v6270_v6 }
 0x3b8   : > { %4988 = vmatprep.subr.bf16.mxu1 %v6037_v47  ;;  %v1431_v23 = vmul.f32 %v5338_v62, %v6272_v34 }
 0x3ba   : > { %4665 = vmatprep.mubr.msk.f32.mxu1 %vm1266_vm2, %v1431_v23 }
 0x3bb   : > { %v1392_v51 = vpop.xlane.xlu1 %1391  ;;  %4666 = vmatmul.mubr.msk.f32.vlgmr.msra.gmra.mrb[20].mxu1 %vm1266_vm2, %v1432_v17 }
 0x3bc   : > { %5343 = vrcp.f32 %v1392_v51  ;;  %4990 = vmatpush3.bf16.msra.mxu1 %v6037_v47  ;;  %v1389_v63 = vpop.xlane.xlu0 %1388  ;;  %v6909_v47 = vld [vmem:[#allocation22_spill] sm:$0xff] }
 0x3bd   : > { %4992 = vmatprep.subr.bf16.mxu1 %v6908_v31  ;;  %5345 = vrcp.f32 %v1389_v63 }
 0x3be   : > { %v5340_v38 = vpop.eup %5339 }
 0x3bf   : > { %v5342_v35 = vpop.eup %5341  ;;  %v1434_v34 = vmul.f32 %v5340_v38, %v6280_v26  ;;  %v6910_v26 = vld [vmem:[#allocation25_spill] sm:$0xff] }
 0x3c0   : > { %v1433_v36 = vmul.f32 %v5342_v35, %v6282_v9 }
 0x3c2   : > { %4672 = vmatprep.mubr.msk.f32.mxu1 %vm1266_vm2, %v1433_v36 }
 0x3c3   : > { %v1398_v6 = vpop.xlane.xlu1 %1397  ;;  %4673 = vmatmul.mubr.msk.f32.vlgmr.msra.gmra.mrb[22].mxu1 %vm1266_vm2, %v1434_v34 }
 0x3c4   : > { %5347 = vrcp.f32 %v1398_v6  ;;  %4994 = vmatpush3.bf16.msra.mxu1 %v6908_v31  ;;  %v1395_v4 = vpop.xlane.xlu0 %1394 }
 0x3c5   : > { %4996 = vmatprep.subr.bf16.mxu1 %v6909_v47  ;;  %5349 = vrcp.f32 %v1395_v4 }
 0x3c6   : > { %v5344_v40 = vpop.eup %5343 }
 0x3c7   : > { %v5346_v42 = vpop.eup %5345  ;;  %v1436_v9 = vmul.f32 %v5344_v40, %v6290_v11  ;;  %v5007_v11 = vpack.c.bf16 %v5219_v46, %v5218_v15  ;;  %v2185_v49 = vpop.permute.xlu1 %2184 }
 0x3c8   : > { %v1435_v16 = vmul.f32 %v5346_v42, %v6292_v54  ;;  %v2183_v59 = vpop.permute.xlu0 %2182 }
 0x3ca   : > { %4679 = vmatprep.mubr.msk.f32.mxu1 %vm1266_vm2, %v1435_v16 }
 0x3cb   : > { %4680 = vmatmul.mubr.msk.f32.vlgmr.msra.gmra.mrb[24].mxu1 %vm1266_vm2, %v1436_v9 }
 0x3cc   : > { %4998 = vmatpush3.bf16.msra.mxu1 %v6909_v47 }
 0x3cd   : > { %5000 = vmatprep.subr.bf16.mxu1 %v6910_v26 }
 0x3ce   : > { %v5348_v61 = vpop.eup %5347 }
 0x3cf   : > { %v5350_v27 = vpop.eup %5349  ;;  %v1438_v54 = vmul.f32 %v5348_v61, %v6298_v12 }
 0x3d0   : > { %v1437_v29 = vmul.f32 %v5350_v27, %v6300_v28 }
 0x3d2   : > { %4686 = vmatprep.mubr.msk.f32.mxu1 %vm1266_vm2, %v1437_v29 }
 0x3d3   : > { %4687 = vmatmul.mubr.msk.f32.vlgmr.msra.gmra.mrb[26].mxu1 %vm1266_vm2, %v1438_v54 }
 0x3d4   : > { %5002 = vmatpush3.bf16.msra.mxu1 %v6910_v26 }
 0x3d5   : > { %5009 = vmatprep.subr.msk.bf16.mxu1 %vm5948_vm1, %v5007_v11 }
 0x3f8   : > { %v1404_v50 = vpop.xlane.xlu1 %1403 }
 0x3f9   : > { %5351 = vrcp.f32 %v1404_v50  ;;  %v1401_v58 = vpop.xlane.xlu0 %1400 }
 0x3fa   : > { %5353 = vrcp.f32 %v1401_v58 }
 0x3fc   : > { %v1410_v10 = vpop.xlane.xlu1 %1409 }
 0x3fd   : > { %5355 = vrcp.f32 %v1410_v10  ;;  %v1407_v28 = vpop.xlane.xlu0 %1406 }
 0x3fe   : > { %5357 = vrcp.f32 %v1407_v28 }
 0x400   : > { %v2274_v12 = vpop.permute.xlu1 %2273 }
 0x401   : > { %v5237_v3 = vpop.permute.xlu0 %5236 }
 0x402   : > { %v5239_v24 = vunpack.i.h.bf16 %v5237_v3  ;;  %v5238_v5 = vunpack.i.l.bf16 %v5237_v3 }
 0x403   : > { %v5352_v33 = vpop.eup %5351 }
 0x404   : > { %v5354_v48 = vpop.eup %5353  ;;  %v5242_v57 = vpop.permute.xlu1 %5241  ;;  %v1440_v2 = vmul.f32 %v5352_v33, %v6314_v18 }
 0x405   : > { %v2276_v60 = vpop.permute.xlu0 %2275  ;;  %v1439_v1 = vmul.f32 %v5354_v48, %v6316_v22  ;;  %v5243_v30 = vunpack.i.l.bf16 %v5242_v57 }
 0x407   : > { %v5356_v8 = vpop.eup %5355  ;;  %4693 = vmatprep.mubr.msk.f32.mxu1 %vm1266_vm2, %v1439_v1 }
 0x408   : > { %v5358_v13 = vpop.eup %5357  ;;  %v2367_v37 = vpop.permute.xlu1 %2366  ;;  %4694 = vmatmul.mubr.msk.f32.vlgmr.msra.gmra.mrb[28].mxu1 %vm1266_vm2, %v1440_v2  ;;  %v1442_v44 = vmul.f32 %v5356_v8, %v6320_v19  ;;  %v5031_v19 = vpack.c.bf16 %v5239_v24, %v5238_v5 }
 0x409   : > { %5012 = vmatpush3.bf16.xpose.msk.msra.mxu1 %vm5948_vm1, %v5007_v11  ;;  %4707 = vmatprep.mubr.msk.f32.mxu1 %vm569_vm0, %v6912_v0  ;;  %v2365_v22 = vpop.permute.xlu0 %2364  ;;  %v1441_v18 = vmul.f32 %v5358_v13, %v6324_v56  ;;  %v5244_v56 = vunpack.i.h.bf16 %v5242_v57 }
 0x40a   : > { %5021 = vmatprep.subr.msk.bf16.mxu1 %vm5948_vm1, %v5019_v14 }
 0x40b   : > { %4700 = vmatprep.mubr.msk.f32.mxu0 %vm1266_vm2, %v1441_v18  ;;  %v5037_v62 = vpack.c.bf16 %v5244_v56, %v5243_v30 }
 0x40c   : > { %v2456_v7 = vpop.permute.xlu1 %2455  ;;  %4701 = vmatmul.mubr.msk.f32.vlgmr.msra.gmra.mrb[32].mxu0 %vm1266_vm2, %v1442_v44 }
 0x40d   : > { %5018 = vmatpush3.bf16.xpose.msk.msra.mxu0 %vm5948_vm1, %v6913_v25  ;;  %v5247_v32 = vpop.permute.xlu0 %5246  ;;  %4714 = vmatprep.mubr.msk.f32.mxu0 %vm569_vm0, %v2183_v59 }
 0x40e   : > { %5027 = vmatprep.subr.msk.bf16.mxu0 %vm5948_vm1, %v5025_v41  ;;  %v5249_v23 = vunpack.i.h.bf16 %v5247_v32  ;;  %v5248_v17 = vunpack.i.l.bf16 %v5247_v32 }
 0x410   : > { %4708 = vmatmul.mubr.msk.f32.vlgmr.msra.gmra.mrb[30].mxu1 %vm569_vm0, %v6364_v45  ;;  %v5252_v39 = vpop.permute.xlu1 %5251  ;;  %v5043_v63 = vpack.c.bf16 %v5249_v23, %v5248_v17 }
 0x411   : > { %5024 = vmatpush3.bf16.xpose.msk.msra.mxu1 %vm5948_vm1, %v5019_v14  ;;  %v2458_v55 = vpop.permute.xlu0 %2457  ;;  %4721 = vmatprep.mubr.msk.f32.mxu1 %vm569_vm0, %v2274_v12  ;;  %v5254_v31 = vunpack.i.h.bf16 %v5252_v39  ;;  %v5253_v38 = vunpack.i.l.bf16 %v5252_v39 }
 0x412   : > { %5033 = vmatprep.subr.msk.bf16.mxu1 %vm5948_vm1, %v5031_v19 }
 0x413   : > { %v5049_v34 = vpack.c.bf16 %v5254_v31, %v5253_v38 }
 0x414   : > { %4715 = vmatmul.mubr.msk.f32.vlgmr.msra.gmra.mrb[34].mxu0 %vm569_vm0, %v2185_v49  ;;  %v2549_v51 = vpop.permute.xlu1 %2548 }
 0x415   : > { %5030 = vmatpush3.bf16.xpose.msk.msra.mxu0 %vm5948_vm1, %v5025_v41  ;;  %v2547_v45 = vpop.permute.xlu0 %2546  ;;  %4728 = vmatprep.mubr.msk.f32.mxu0 %vm569_vm0, %v2365_v22 }
 0x416   : > { %5039 = vmatprep.subr.msk.bf16.mxu0 %vm5948_vm1, %v5037_v62 }
 0x418   : > { %4722 = vmatmul.mubr.msk.f32.vlgmr.msra.gmra.mrb[32].mxu1 %vm569_vm0, %v2276_v60  ;;  %v2640_v35 = vpop.permute.xlu1 %2639 }
 0x419   : > { %5036 = vmatpush3.bf16.xpose.msk.msra.mxu1 %vm5948_vm1, %v5031_v19  ;;  %v2638_v36 = vpop.permute.xlu0 %2637  ;;  %4735 = vmatprep.mubr.msk.f32.mxu1 %vm569_vm0, %v2456_v7 }
 0x41a   : > { %5045 = vmatprep.subr.msk.bf16.mxu1 %vm5948_vm1, %v5043_v63 }
 0x41c   : > { %4729 = vmatmul.mubr.msk.f32.vlgmr.msra.gmra.mrb[36].mxu0 %vm569_vm0, %v2367_v37  ;;  %v2731_v6 = vpop.permute.xlu1 %2730 }
 0x41d   : > { %5042 = vmatpush3.bf16.xpose.msk.msra.mxu0 %vm5948_vm1, %v5037_v62  ;;  %v2729_v4 = vpop.permute.xlu0 %2728  ;;  %4742 = vmatprep.mubr.msk.f32.mxu0 %vm569_vm0, %v2547_v45 }
 0x41e   : > { %5051 = vmatprep.subr.msk.bf16.mxu0 %vm5948_vm1, %v5049_v34 }
 0x420   : > { %4736 = vmatmul.mubr.msk.f32.vlgmr.msra.gmra.mrb[34].mxu1 %vm569_vm0, %v2458_v55  ;;  %v5262_v47 = vpop.permute.xlu1 %5261 }
 0x421   : > { %v5264_v40 = vunpack.i.h.bf16 %v5262_v47  ;;  %v5263_v42 = vunpack.i.l.bf16 %v5262_v47  ;;  %5048 = vmatpush3.bf16.xpose.msk.msra.mxu1 %vm5948_vm1, %v5043_v63  ;;  %v5257_v16 = vpop.permute.xlu0 %5256  ;;  %4749 = vmatprep.mubr.msk.f32.mxu1 %vm569_vm0, %v2638_v36  ;;  %v6914_v47 = vld [vmem:[#allocation21_spill] sm:$0xff] }
 0x422   : > { %v5259_v9 = vunpack.i.h.bf16 %v5257_v16  ;;  %v5258_v26 = vunpack.i.l.bf16 %v5257_v16  ;;  %v6917_v16 = vld [vmem:[#allocation18_spill] sm:$0xff] }
 0x423   : > { %v5059_v61 = vpack.c.bf16 %v5264_v40, %v5263_v42  ;;  %v6915_v40 = vld [vmem:[#allocation20_spill] sm:$0xff] }
 0x424   : > { %v5055_v27 = vpack.c.bf16 %v5259_v9, %v5258_v26  ;;  %4743 = vmatmul.mubr.msk.f32.vlgmr.msra.gmra.mrb[38].mxu0 %vm569_vm0, %v2549_v51  ;;  %v5272_v46 = vpop.permute.xlu1 %5271  ;;  %v6916_v42 = vpack.i.bf16 %v6914_v47, %v6915_v40  ;;  %v6918_v9 = vld [vmem:[#allocation17_spill] sm:$0xff] }
 0x425   : > { %5054 = vmatpush3.bf16.xpose.msk.msra.mxu0 %vm5948_vm1, %v5049_v34  ;;  %v5267_v15 = vpop.permute.xlu0 %5266  ;;  %4756 = vmatprep.mubr.msk.f32.mxu0 %vm569_vm0, %v2729_v4  ;;  %v5274_v11 = vunpack.i.h.bf16 %v5272_v46  ;;  %v5273_v49 = vunpack.i.l.bf16 %v5272_v46  ;;  %v6919_v26 = vpack.i.bf16 %v6917_v16, %v6918_v9 }
 0x426   : > { %v5269_v29 = vunpack.i.h.bf16 %v5267_v15  ;;  %v5268_v54 = vunpack.i.l.bf16 %v5267_v15  ;;  %5060 = vmatprep.subr.bf16.mxu0 %v5059_v61  ;;  %5056 = vmatprep.subr.bf16.mxu1 %v5055_v27 }
 0x427   : > { %v6490_v50 = vpack.c.bf16 %v5274_v11, %v5273_v49 }
 0x428   : > { %v6486_v59 = vpack.c.bf16 %v5269_v29, %v5268_v54  ;;  %4750 = vmatmul.mubr.msk.f32.vlgmr.msra.gmra.mrb[36].mxu1 %vm569_vm0, %v2640_v35 }
 0x429   : > { %5058 = vmatpush3.bf16.msra.mxu1 %v5055_v27 }
 0x42a   : > { %5064 = vmatprep.subr.bf16.mxu1 %v6486_v59 }
 0x42c   : > { %4757 = vmatmul.mubr.msk.f32.vlgmr.msra.gmra.mrb[40].mxu0 %vm569_vm0, %v2731_v6 }
 0x42d   : > { %5062 = vmatpush3.bf16.msra.mxu0 %v5059_v61 }
 0x42e   : > { %5068 = vmatprep.subr.bf16.mxu0 %v6490_v50 }
 0x480   : > { %v6494_v43 = vpop.f32.mrb[16].mxu1 }
 0x481   : > { %v6496_v58 = vpop.f32.mrb[17].mxu1 }
 0x489   : > { %v6498_v10 = vpop.f32.mrb[18].mxu1 }
 0x48a   : > { %v6500_v28 = vpop.f32.mrb[19].mxu1 }
 0x48e   : > { %v6502_v12 = vpop.f32.mrb[20].mxu1 }
 0x48f   : > { %v6504_v3 = vpop.f32.mrb[21].mxu1 }
 0x496   : > { %v6506_v33 = vpop.f32.mrb[22].mxu1 }
 0x497   : > { %v6508_v48 = vpop.f32.mrb[23].mxu1 }
 0x49e   : > { %v6510_v52 = vpop.f32.mrb[24].mxu1 }
 0x49f   : > { %v6512_v53 = vpop.f32.mrb[25].mxu1 }
 0x4a6   : > { %v6514_v57 = vpop.f32.mrb[26].mxu1 }
 0x4a7   : > { %v6516_v60 = vpop.f32.mrb[27].mxu1 }
 0x4db   : > { %v6518_v1 = vpop.f32.mrb[28].mxu1 }
 0x4dc   : > { %v6520_v2 = vpop.f32.mrb[29].mxu1 }
 0x4df   : > { %v6522_v8 = vpop.f32.mrb[32].mxu0 }
 0x4e0   : > { %v6524_v13 = vpop.f32.mrb[33].mxu0 }
 0x4e3   : > { %v4709_v14 = vpop.f32.mrb[30].mxu1 }
 0x4e4   : > { %v2173_v21 = vpop.f32.mrb[31].mxu1  ;;  %v2822_v20 = vsel %vm1266_vm2, %v4709_v14, -inf }
 0x4e5   : > { %2823 = vmax.xlane.f32.xlu1 %v2822_v20  ;;  %v2819_v37 = vsel %vm1266_vm2, %v2173_v21, -inf }
 0x4e6   : > { %2820 = vmax.xlane.f32.xlu0 %v2819_v37 }
 0x4e7   : > { %v4716_v0 = vpop.f32.mrb[34].mxu0 }
 0x4e8   : > { %v2264_v22 = vpop.f32.mrb[35].mxu0  ;;  %v2828_v18 = vsel %vm1266_vm2, %v4716_v0, -inf }
 0x4e9   : > { %v2825_v5 = vsel %vm1266_vm2, %v2264_v22, -inf }
 0x4ea   : > { %2829 = vmax.xlane.f32.xlu0 %v2828_v18 }
 0x4eb   : > { %v4723_v44 = vpop.f32.mrb[32].mxu1 }
 0x4ec   : > { %v6529_v41 = vpop.f32.mrb[33].mxu1  ;;  %v2834_v24 = vsel %vm1266_vm2, %v4723_v44, -inf }
 0x4ed   : > { %2835 = vmax.xlane.f32.xlu1 %v2834_v24  ;;  %v2831_v19 = vsel %vm1266_vm2, %v6529_v41, -inf }
 0x4ee   : > { %2826 = vmax.xlane.f32.xlu0 %v2825_v5 }
 0x4ef   : > { %v4730_v7 = vpop.f32.mrb[36].mxu0 }
 0x4f0   : > { %v6533_v25 = vpop.f32.mrb[37].mxu0  ;;  %v2840_v32 = vsel %vm1266_vm2, %v4730_v7, -inf }
 0x4f1   : > { %2841 = vmax.xlane.f32.xlu1 %v2840_v32  ;;  %v2837_v55 = vsel %vm1266_vm2, %v6533_v25, -inf }
 0x4f2   : > { %2832 = vmax.xlane.f32.xlu0 %v2831_v19 }
 0x4f3   : > { %v6538_v56 = vpop.f32.mrb[34].mxu1 }
 0x4f4   : > { %v2846_v30 = vsel %vm1266_vm2, %v6538_v56, -inf  ;;  %v6542_v39 = vpop.f32.mrb[35].mxu1 }
 0x4f5   : > { %2847 = vmax.xlane.f32.xlu1 %v2846_v30  ;;  %v2843_v51 = vsel %vm1266_vm2, %v6542_v39, -inf }
 0x4f6   : > { %2838 = vmax.xlane.f32.xlu0 %v2837_v55 }
 0x4f7   : > { %v6546_v62 = vpop.f32.mrb[38].mxu0 }
 0x4f8   : > { %v2852_v23 = vsel %vm1266_vm2, %v6546_v62, -inf  ;;  %v6550_v17 = vpop.f32.mrb[39].mxu0 }
 0x4f9   : > { %2853 = vmax.xlane.f32.xlu1 %v2852_v23  ;;  %v2849_v38 = vsel %vm1266_vm2, %v6550_v17, -inf }
 0x4fa   : > { %2844 = vmax.xlane.f32.xlu0 %v2843_v51 }
 0x4fb   : > { %v6554_v45 = vpop.f32.mrb[36].mxu1 }
 0x4fc   : > { %v2858_v63 = vsel %vm1266_vm2, %v6554_v45, -inf  ;;  %v6558_v31 = vpop.f32.mrb[37].mxu1 }
 0x4fd   : > { %2859 = vmax.xlane.f32.xlu1 %v2858_v63  ;;  %v2855_v6 = vsel %vm1266_vm2, %v6558_v31, -inf }
 0x4fe   : > { %2850 = vmax.xlane.f32.xlu0 %v2849_v38 }
 0x4ff   : > { %v6562_v35 = vpop.f32.mrb[40].mxu0 }
 0x500   : > { %v2864_v36 = vsel %vm1266_vm2, %v6562_v35, -inf  ;;  %v6566_v34 = vpop.f32.mrb[41].mxu0 }
 0x501   : > { %2865 = vmax.xlane.f32.xlu1 %v2864_v36  ;;  %v2861_v4 = vsel %vm1266_vm2, %v6566_v34, -inf }
 0x502   : > { %2856 = vmax.xlane.f32.xlu0 %v2855_v6 }
 0x506   : > { %2862 = vmax.xlane.f32.xlu0 %v2861_v4 }
 0x512   : > { %5281 = vrot.lane.b32.xlu1 %v6916_v42, %s5628_s24 }
 0x51c   : > { %5276 = vrot.lane.b32.xlu0 %v6919_v26, %s5628_s24 }
 0x572   : > { %v2824_v61 = vpop.xlane.xlu1 %2823 }
 0x573   : > { %v2868_v27 = vsub.f32 %v4709_v14, %v2824_v61  ;;  %v2821_v46 = vpop.xlane.xlu0 %2820 }
 0x574   : > { %v2867_v15 = vsub.f32 %v2173_v21, %v2821_v46 }
 0x575   : > { %v2885_v29 = vmul.f32 1.442695, %v2868_v27 }
 0x576   : > { %v2883_v54 = vmul.f32 1.442695, %v2867_v15 }
 0x577   : > { %5359 = vpow2.f32 %v2885_v29  ;;  %v2830_v11 = vpop.xlane.xlu0 %2829 }
 0x578   : > { %5361 = vpow2.f32 %v2883_v54  ;;  %v2870_v49 = vsub.f32 %v4716_v0, %v2830_v11 }
 0x57a   : > { %v2889_v20 = vmul.f32 1.442695, %v2870_v49  ;;  %v2836_v37 = vpop.xlane.xlu1 %2835 }
 0x57b   : > { %v2872_v18 = vsub.f32 %v4723_v44, %v2836_v37  ;;  %v2827_v24 = vpop.xlane.xlu0 %2826 }
 0x57c   : > { %5363 = vpow2.f32 %v2889_v20  ;;  %v2869_v5 = vsub.f32 %v2264_v22, %v2827_v24 }
 0x57d   : > { %v2893_v32 = vmul.f32 1.442695, %v2872_v18 }
 0x57e   : > { %v2887_v19 = vmul.f32 1.442695, %v2869_v5  ;;  %v2842_v30 = vpop.xlane.xlu1 %2841 }
 0x57f   : > { %5365 = vpow2.f32 %v2893_v32  ;;  %v2874_v55 = vsub.f32 %v4730_v7, %v2842_v30  ;;  %v2833_v14 = vpop.xlane.xlu0 %2832 }
 0x580   : > { %5367 = vpow2.f32 %v2887_v19  ;;  %v2871_v21 = vsub.f32 %v6529_v41, %v2833_v14 }
 0x581   : > { %v6581_v23 = vpop.eup %5359  ;;  %v2897_v51 = vmul.f32 1.442695, %v2874_v55 }
 0x582   : > { %v6583_v63 = vpop.eup %5361  ;;  %v2891_v0 = vmul.f32 1.442695, %v2871_v21  ;;  %v2848_v38 = vpop.xlane.xlu1 %2847  ;;  %v2918_v44 = vsel %vm1266_vm2, %v6581_v23, 0.0 }
 0x583   : > { %5369 = vpow2.f32 %v2897_v51  ;;  %v2876_v22 = vsub.f32 %v6538_v56, %v2848_v38  ;;  %v2839_v36 = vpop.xlane.xlu0 %2838  ;;  %2919 = vadd.xlane.f32.xlu1 %v2918_v44  ;;  %v2915_v7 = vsel %vm1266_vm2, %v6583_v63, 0.0 }
 0x584   : > { %5371 = vpow2.f32 %v2891_v0  ;;  %v2873_v41 = vsub.f32 %v6533_v25, %v2839_v36  ;;  %2916 = vadd.xlane.f32.xlu0 %v2915_v7 }
 0x585   : > { %v2901_v6 = vmul.f32 1.442695, %v2876_v22 }
 0x586   : > { %v6591_v4 = vpop.eup %5363  ;;  %v2895_v47 = vmul.f32 1.442695, %v2873_v41  ;;  %v2854_v40 = vpop.xlane.xlu1 %2853 }
 0x587   : > { %5373 = vpow2.f32 %v2901_v6  ;;  %v2878_v42 = vsub.f32 %v6546_v62, %v2854_v40  ;;  %v2845_v16 = vpop.xlane.xlu0 %2844  ;;  %v2924_v56 = vsel %vm1266_vm2, %v6591_v4, 0.0 }
 0x588   : > { %5375 = vpow2.f32 %v2895_v47  ;;  %v2875_v9 = vsub.f32 %v6542_v39, %v2845_v16  ;;  %2925 = vadd.xlane.f32.xlu1 %v2924_v56 }
 0x589   : > { %v6597_v26 = vpop.eup %5365  ;;  %v2905_v25 = vmul.f32 1.442695, %v2878_v42 }
 0x58a   : > { %v6599_v61 = vpop.eup %5367  ;;  %v2899_v27 = vmul.f32 1.442695, %v2875_v9  ;;  %v2860_v46 = vpop.xlane.xlu1 %2859  ;;  %v2930_v15 = vsel %vm1266_vm2, %v6597_v26, 0.0 }
 0x58b   : > { %5377 = vpow2.f32 %v2905_v25  ;;  %v2880_v62 = vsub.f32 %v6554_v45, %v2860_v46  ;;  %v2851_v29 = vpop.xlane.xlu0 %2850  ;;  %v2921_v54 = vsel %vm1266_vm2, %v6599_v61, 0.0  ;;  %v6920_v25 = vld [vmem:[#allocation27_spill] sm:$0xff] }
 0x58c   : > { %5379 = vpow2.f32 %v2899_v27  ;;  %v2877_v39 = vsub.f32 %v6550_v17, %v2851_v29  ;;  %2931 = vadd.xlane.f32.xlu1 %v2930_v15  ;;  %2922 = vadd.xlane.f32.xlu0 %v2921_v54  ;;  %v6921_v27 = vld [vmem:[#allocation26_spill] sm:$0xff]  ;;  %v6923_v15 = vld [vmem:[#allocation24_spill] sm:$0xff] }
 0x58d   : > { %v6607_v11 = vpop.eup %5369  ;;  %v2909_v49 = vmul.f32 1.442695, %v2880_v62  ;;  %v6922_v46 = vpack.i.bf16 %v6920_v25, %v6921_v27  ;;  %v6924_v62 = vld [vmem:[#allocation23_spill] sm:$0xff] }
 0x58e   : > { %v6609_v20 = vpop.eup %5371  ;;  %v2903_v37 = vmul.f32 1.442695, %v2877_v39  ;;  %v2866_v18 = vpop.xlane.xlu1 %2865  ;;  %v2936_v24 = vsel %vm1266_vm2, %v6607_v11, 0.0  ;;  %v6925_v29 = vpack.i.bf16 %v6923_v15, %v6924_v62 }
 0x58f   : > { %5381 = vpow2.f32 %v2909_v49  ;;  %v2882_v45 = vsub.f32 %v6562_v35, %v2866_v18  ;;  %v2857_v5 = vpop.xlane.xlu0 %2856  ;;  %v2927_v32 = vsel %vm1266_vm2, %v6609_v20, 0.0 }
 0x590   : > { %5383 = vpow2.f32 %v2903_v37  ;;  %v2879_v17 = vsub.f32 %v6558_v31, %v2857_v5  ;;  %2937 = vadd.xlane.f32.xlu1 %v2936_v24  ;;  %2928 = vadd.xlane.f32.xlu0 %v2927_v32 }
 0x591   : > { %v6617_v19 = vpop.eup %5373  ;;  %v2913_v55 = vmul.f32 1.442695, %v2882_v45 }
 0x592   : > { %v6619_v30 = vpop.eup %5375  ;;  %v2907_v14 = vmul.f32 1.442695, %v2879_v17  ;;  %v2942_v21 = vsel %vm1266_vm2, %v6617_v19, 0.0  ;;  %v5282_v54 = vpop.permute.xlu1 %5281 }
 0x593   : > { %v2863_v51 = vpop.xlane.xlu0 %2862  ;;  %v2933_v35 = vsel %vm1266_vm2, %v6619_v30, 0.0 }
 0x594   : > { %5385 = vpow2.f32 %v2907_v14  ;;  %v2881_v0 = vsub.f32 %v6566_v34, %v2863_v51  ;;  %2943 = vadd.xlane.f32.xlu1 %v2942_v21  ;;  %2934 = vadd.xlane.f32.xlu0 %v2933_v35 }
 0x595   : > { %v6626_v31 = vpop.eup %5377  ;;  %5387 = vpow2.f32 %v2913_v55 }
 0x596   : > { %v6628_v38 = vpop.eup %5379  ;;  %v2911_v44 = vmul.f32 1.442695, %v2881_v0  ;;  %v2948_v22 = vsel %vm1266_vm2, %v6626_v31, 0.0 }
 0x597   : > { %v2939_v36 = vsel %vm1266_vm2, %v6628_v38, 0.0  ;;  %v5277_v39 = vpop.permute.xlu0 %5276 }
 0x598   : > { %5389 = vpow2.f32 %v2911_v44  ;;  %2949 = vadd.xlane.f32.xlu1 %v2948_v22  ;;  %2940 = vadd.xlane.f32.xlu0 %v2939_v36  ;;  %v5279_v17 = vunpack.i.h.bf16 %v5277_v39  ;;  %v5278_v55 = vunpack.i.l.bf16 %v5277_v39 }
 0x599   : > { %v6634_v7 = vpop.eup %5381 }
 0x59a   : > { %v6636_v34 = vpop.eup %5383  ;;  %v2954_v41 = vsel %vm1266_vm2, %v6634_v7, 0.0  ;;  %v5071_v0 = vpack.c.bf16 %v5279_v17, %v5278_v55 }
 0x59b   : > { %v2945_v6 = vsel %vm1266_vm2, %v6636_v34, 0.0 }
 0x59c   : > { %2955 = vadd.xlane.f32.xlu1 %v2954_v41  ;;  %2946 = vadd.xlane.f32.xlu0 %v2945_v6  ;;  %v5284_v6 = vunpack.i.h.bf16 %v5282_v54 }
 0x59e   : > { %v6642_v47 = vpop.eup %5385 }
 0x59f   : > { %v2951_v40 = vsel %vm1266_vm2, %v6642_v47, 0.0  ;;  %v6646_v42 = vpop.eup %5387 }
 0x5a0   : > { %2952 = vadd.xlane.f32.xlu1 %v2951_v40  ;;  %v2960_v56 = vsel %vm1266_vm2, %v6646_v42, 0.0 }
 0x5a2   : > { %v6648_v16 = vpop.eup %5389 }
 0x5a3   : > { %v2957_v9 = vsel %vm1266_vm2, %v6648_v16, 0.0 }
 0x5a4   : > { %2961 = vadd.xlane.f32.xlu1 %v2960_v56  ;;  %2958 = vadd.xlane.f32.xlu0 %v2957_v9 }
 0x5b5   : > { %5291 = vrot.lane.b32.xlu1 %v6922_v46, %s5628_s24 }
 0x5ba   : > { %5286 = vrot.lane.b32.xlu0 %v6925_v29, %s5628_s24 }
 0x610   : > { %v2920_v49 = vpop.xlane.xlu1 %2919 }
 0x611   : > { %5391 = vrcp.f32 %v2920_v49  ;;  %v2917_v37 = vpop.xlane.xlu0 %2916 }
 0x612   : > { %5393 = vrcp.f32 %v2917_v37 }
 0x615   : > { %v2926_v18 = vpop.xlane.xlu1 %2925 }
 0x616   : > { %5395 = vrcp.f32 %v2926_v18 }
 0x619   : > { %v2932_v24 = vpop.xlane.xlu1 %2931  ;;  %v2923_v45 = vpop.xlane.xlu0 %2922 }
 0x61a   : > { %5397 = vrcp.f32 %v2923_v45 }
 0x61b   : > { %v5392_v5 = vpop.eup %5391  ;;  %5399 = vrcp.f32 %v2932_v24 }
 0x61c   : > { %v5394_v32 = vpop.eup %5393  ;;  %v2980_v35 = vmul.f32 %v5392_v5, %v6581_v23 }
 0x61d   : > { %v2938_v14 = vpop.xlane.xlu1 %2937  ;;  %v2929_v21 = vpop.xlane.xlu0 %2928  ;;  %v2979_v51 = vmul.f32 %v5394_v32, %v6583_v63  ;;  %v5283_v63 = vunpack.i.l.bf16 %v5282_v54  ;;  %v553_v32 = vld [vmem:[#allocation8] sm:$0xff] }
 0x61e   : > { %5401 = vrcp.f32 %v2929_v21 }
 0x61f   : > { %4763 = vmatprep.mubr.msk.f32.mxu1 %vm1266_vm2, %v2979_v51  ;;  %5403 = vrcp.f32 %v2938_v14  ;;  %v5075_v27 = vpack.c.bf16 %v5284_v6, %v5283_v63  ;;  %v554_v51 = vld [vmem:[#allocation8 + $0x8] sm:$0xff] }
 0x620   : > { %4764 = vmatmul.mubr.msk.f32.vlgmr.msra.gmra.mrb[38].mxu1 %vm1266_vm2, %v2980_v35  ;;  %v5396_v36 = vpop.eup %5395  ;;  %v561_v35 = vld [vmem:[#allocation8 + $0x40] sm:$0xff]  ;;  %v5103_v63 = vpack.c.bf16 %v554_v51, %v553_v32 }
 0x621   : > { %5066 = vmatpush3.bf16.msra.mxu1 %v6486_v59  ;;  %v2944_v44 = vpop.xlane.xlu1 %2943  ;;  %v2935_v22 = vpop.xlane.xlu0 %2934  ;;  %v2982_v9 = vmul.f32 %v5396_v36, %v6591_v4 }
 0x622   : > { %5072 = vmatprep.subr.bf16.mxu1 %v5071_v0  ;;  %5405 = vrcp.f32 %v2935_v22 }
 0x623   : > { %5407 = vrcp.f32 %v2944_v44 }
 0x624   : > { %v5398_v41 = vpop.eup %5397 }
 0x625   : > { %v2950_v40 = vpop.xlane.xlu1 %2949  ;;  %v2941_v23 = vpop.xlane.xlu0 %2940  ;;  %v2981_v56 = vmul.f32 %v5398_v41, %v6599_v61 }
 0x626   : > { %5409 = vrcp.f32 %v2941_v23  ;;  %v5400_v25 = vpop.eup %5399  ;;  %v556_v23 = vld [vmem:[#allocation8 + $0x18] sm:$0xff] }
 0x627   : > { %4770 = vmatprep.mubr.msk.f32.mxu0 %vm1266_vm2, %v2981_v56  ;;  %5411 = vrcp.f32 %v2950_v40  ;;  %v2984_v29 = vmul.f32 %v5400_v25, %v6597_v26  ;;  %v555_v40 = vld [vmem:[#allocation8 + $0x10] sm:$0xff] }
 0x628   : > { %v5402_v59 = vpop.eup %5401  ;;  %4771 = vmatmul.mubr.msk.f32.vlgmr.msra.gmra.mrb[42].mxu0 %vm1266_vm2, %v2982_v9  ;;  %v563_v25 = vld [vmem:[#allocation8 + $0x50] sm:$0xff] }
 0x629   : > { %v2956_v46 = vpop.xlane.xlu1 %2955  ;;  %v2947_v15 = vpop.xlane.xlu0 %2946  ;;  %5070 = vmatpush3.bf16.msra.mxu0 %v6490_v50  ;;  %v2983_v62 = vmul.f32 %v5402_v59, %v6609_v20  ;;  %v564_v59 = vld [vmem:[#allocation8 + $0x58] sm:$0xff] }
 0x62a   : > { %5076 = vmatprep.subr.bf16.mxu0 %v5075_v27  ;;  %5413 = vrcp.f32 %v2947_v15  ;;  %v5404_v4 = vpop.eup %5403  ;;  %v558_v15 = vld [vmem:[#allocation8 + $0x28] sm:$0xff] }
 0x62b   : > { %4777 = vmatprep.mubr.msk.f32.mxu1 %vm1266_vm2, %v2983_v62  ;;  %v2986_v49 = vmul.f32 %v5404_v4, %v6607_v11  ;;  %v565_v4 = vld [vmem:[#allocation8 + $0x60] sm:$0xff] }
 0x62c   : > { %v5406_v61 = vpop.eup %5405  ;;  %4778 = vmatmul.mubr.msk.f32.vlgmr.msra.gmra.mrb[40].mxu1 %vm1266_vm2, %v2984_v29 }
 0x62d   : > { %v2953_v54 = vpop.xlane.xlu1 %2952  ;;  %5074 = vmatpush3.bf16.msra.mxu1 %v5071_v0  ;;  %v2985_v39 = vmul.f32 %v5406_v61, %v6619_v30  ;;  %v5408_v50 = vpop.eup %5407  ;;  %v562_v0 = vld [vmem:[#allocation8 + $0x48] sm:$0xff] }
 0x62e   : > { %5415 = vrcp.f32 %v2953_v54  ;;  %v2988_v24 = vmul.f32 %v5408_v50, %v6617_v19  ;;  %v5087_v56 = vpack.c.bf16 %v562_v0, %v561_v35  ;;  %v566_v61 = vld [vmem:[#allocation8 + $0x68] sm:$0xff]  ;;  %v560_v54 = vld [vmem:[#allocation8 + $0x38] sm:$0xff] }
 0x62f   : > { %5417 = vrcp.f32 %v2956_v46  ;;  %4784 = vmatprep.mubr.msk.f32.mxu0 %vm1266_vm2, %v2985_v39  ;;  %v557_v46 = vld [vmem:[#allocation8 + $0x20] sm:$0xff]  ;;  %v5095_v39 = vpack.c.bf16 %v566_v61, %v565_v4  ;;  %v568_v50 = vld [vmem:[#allocation8 + $0x78] sm:$0xff] }
 0x630   : > { %v5410_v26 = vpop.eup %5409  ;;  %4785 = vmatmul.mubr.msk.f32.vlgmr.msra.gmra.mrb[44].mxu0 %vm1266_vm2, %v2986_v49  ;;  %v5111_v29 = vpack.c.bf16 %v558_v15, %v557_v46  ;;  %v567_v49 = vld [vmem:[#allocation8 + $0x70] sm:$0xff] }
 0x631   : > { %v2962_v20 = vpop.xlane.xlu1 %2961  ;;  %v2959_v37 = vpop.xlane.xlu0 %2958  ;;  %5078 = vmatpush3.bf16.msra.mxu0 %v5075_v27  ;;  %v2987_v18 = vmul.f32 %v5410_v26, %v6628_v38 }
 0x632   : > { %5419 = vrcp.f32 %v2962_v20  ;;  %v5412_v45 = vpop.eup %5411 }
 0x633   : > { %5421 = vrcp.f32 %v2959_v37  ;;  %4791 = vmatprep.mubr.msk.f32.mxu1 %vm1266_vm2, %v2987_v18  ;;  %v2990_v44 = vmul.f32 %v5412_v45, %v6626_v31  ;;  %v5107_v31 = vpack.c.bf16 %v556_v23, %v555_v40 }
 0x634   : > { %v5414_v11 = vpop.eup %5413  ;;  %4792 = vmatmul.mubr.msk.f32.vlgmr.msra.gmra.mrb[42].mxu1 %vm1266_vm2, %v2988_v24 }
 0x635   : > { %v5292_v30 = vpop.permute.xlu1 %5291  ;;  %v5287_v5 = vpop.permute.xlu0 %5286  ;;  %v2989_v38 = vmul.f32 %v5414_v11, %v6636_v34 }
 0x636   : > { %v5294_v17 = vunpack.i.h.bf16 %v5292_v30  ;;  %v5293_v55 = vunpack.i.l.bf16 %v5292_v30  ;;  %v5289_v14 = vunpack.i.h.bf16 %v5287_v5  ;;  %v5288_v21 = vunpack.i.l.bf16 %v5287_v5 }
 0x637   : > { %4798 = vmatprep.mubr.msk.f32.mxu0 %vm1266_vm2, %v2989_v38 }
 0x638   : > { %v5416_v19 = vpop.eup %5415  ;;  %v5083_v22 = vpack.c.bf16 %v5294_v17, %v5293_v55  ;;  %v5079_v36 = vpack.c.bf16 %v5289_v14, %v5288_v21  ;;  %4799 = vmatmul.mubr.msk.f32.vlgmr.msra.gmra.mrb[46].mxu0 %vm1266_vm2, %v2990_v44 }
 0x639   : > { %v5418_v41 = vpop.eup %5417  ;;  %v2991_v6 = vmul.f32 %v5416_v19, %v6642_v47  ;;  %v6749_v19 = vld [vmem:[%s6842_s4] ss:$0 sm:$0xff] }
 0x63a   : > { %5080 = vmatprep.subr.bf16.mxu1 %v5079_v36  ;;  %5084 = vmatprep.subr.bf16.mxu0 %v5083_v22  ;;  %v2992_v9 = vmul.f32 %v5418_v41, %v6634_v7  ;;  %v5091_v7 = vpack.c.bf16 %v564_v59, %v563_v25 }
 0x63b   : > { %5082 = vmatpush3.bf16.msra.mxu1 %v5079_v36  ;;  %4805 = vmatprep.mubr.msk.f32.mxu1 %vm1266_vm2, %v2991_v6 }
 0x63c   : > { %v5420_v34 = vpop.eup %5419  ;;  %5086 = vmatpush3.bf16.msra.mxu0 %v5083_v22  ;;  %5104 = vmatprep.subr.bf16.mxu1 %v5103_v63 }
 0x63d   : > { %v5422_v27 = vpop.eup %5421  ;;  %v2994_v47 = vmul.f32 %v5420_v34, %v6646_v42  ;;  %5088 = vmatprep.subr.bf16.mxu0 %v5087_v56  ;;  %v559_v42 = vld [vmem:[#allocation8 + $0x30] sm:$0xff] }
 0x63e   : > { %4806 = vmatmul.mubr.msk.f32.vlgmr.msra.gmra.mrb[44].mxu1 %vm1266_vm2, %v2992_v9  ;;  %v2993_v62 = vmul.f32 %v5422_v27, %v6648_v16  ;;  %v5115_v16 = vpack.c.bf16 %v560_v54, %v559_v42 }
 0x63f   : > { %5106 = vmatpush3.bf16.msra.mxu1 %v5103_v63  ;;  %4871 = vmatprep.mubr.msk.f32.mxu1 %vm569_vm0, %v6496_v58  ;;  %v5099_v58 = vpack.c.bf16 %v568_v50, %v567_v49 }
 0x640   : > { %4812 = vmatprep.mubr.msk.f32.mxu0 %vm1266_vm2, %v2993_v62  ;;  %5108 = vmatprep.subr.bf16.mxu1 %v5107_v31 }
 0x641   : > { %4813 = vmatmul.mubr.msk.f32.vlgmr.msra.gmra.mrb[48].mxu0 %vm1266_vm2, %v2994_v47 }
 0x642   : > { %5090 = vmatpush3.bf16.msra.mxu0 %v5087_v56 }
 0x643   : > { %5110 = vmatpush3.bf16.msra.mxu1 %v5107_v31  ;;  %5092 = vmatprep.subr.bf16.mxu0 %v5091_v7 }
 0x644   : > { %5112 = vmatprep.subr.bf16.mxu1 %v5111_v29 }
 0x646   : > { %5094 = vmatpush3.bf16.msra.mxu0 %v5091_v7 }
 0x647   : > { %5114 = vmatpush3.bf16.msra.mxu1 %v5111_v29  ;;  %5096 = vmatprep.subr.bf16.mxu0 %v5095_v39 }
 0x648   : > { %5116 = vmatprep.subr.bf16.mxu1 %v5115_v16 }
 0x64a   : > { %5098 = vmatpush3.bf16.msra.mxu0 %v5095_v39 }
 0x64b   : > { %5118 = vmatpush3.bf16.msra.mxu1 %v5115_v16  ;;  %5100 = vmatprep.subr.bf16.mxu0 %v5099_v58 }
 0x64e   : > { %4872 = vmatmul.mubr.msk.f32.vlgmr.msra.gmra.mrb[46].mxu1 %vm569_vm0, %v6494_v43  ;;  %5102 = vmatpush3.bf16.msra.mxu0 %v5099_v58 }
 0x64f   : > { %4874 = vmatprep.mubr.msk.f32.mxu1 %vm569_vm0, %v6500_v28 }
 0x652   : > { %4875 = vmatmul.mubr.msk.f32.gmra.mrb[48].mxu1 %vm569_vm0, %v6498_v10 }
 0x653   : > { %4877 = vmatprep.mubr.msk.f32.mxu1 %vm569_vm0, %v6504_v3 }
 0x656   : > { %4878 = vmatmul.mubr.msk.f32.gmra.mrb[50].mxu1 %vm569_vm0, %v6502_v12 }
 0x657   : > { %4880 = vmatprep.mubr.msk.f32.mxu1 %vm569_vm0, %v6508_v48 }
 0x65a   : > { %4881 = vmatmul.mubr.msk.f32.gmra.mrb[52].mxu1 %vm569_vm0, %v6506_v33 }
 0x65b   : > { %4883 = vmatprep.mubr.msk.f32.mxu1 %vm569_vm0, %v6512_v53 }
 0x65e   : > { %4884 = vmatmul.mubr.msk.f32.gmra.mrb[54].mxu1 %vm569_vm0, %v6510_v52 }
 0x65f   : > { %4886 = vmatprep.mubr.msk.f32.mxu1 %vm569_vm0, %v6516_v60 }
 0x662   : > { %4887 = vmatmul.mubr.msk.f32.gmra.mrb[56].mxu1 %vm569_vm0, %v6514_v57 }
 0x663   : > { %4889 = vmatprep.mubr.msk.f32.mxu1 %vm569_vm0, %v6520_v2 }
 0x666   : > { %4890 = vmatmul.mubr.msk.f32.gmra.mrb[58].mxu1 %vm569_vm0, %v6518_v1 }
 0x667   : > { %4892 = vmatprep.mubr.msk.f32.mxu1 %vm569_vm0, %v6524_v13 }
 0x66a   : > { %4893 = vmatmul.mubr.msk.f32.gmra.mrb[60].mxu1 %vm569_vm0, %v6522_v8 }
 0x6f3   : > { %v4765_v43 = vpop.f32.mrb[38].mxu1 }
 0x6f4   : > { %v3075_v10 = vpop.f32.mrb[39].mxu1 }
 0x6f5   : > { %4831 = vmatprep.mubr.msk.f32.mxu0 %vm569_vm0, %v3075_v10 }
 0x6f6   : > { %4832 = vmatmul.mubr.msk.f32.vlgmr.msra.gmra.mrb[50].mxu0 %vm569_vm0, %v4765_v43 }
 0x6fb   : > { %v4772_v28 = vpop.f32.mrb[42].mxu0 }
 0x6fc   : > { %v3164_v12 = vpop.f32.mrb[43].mxu0 }
 0x6fd   : > { %4834 = vmatprep.mubr.msk.f32.mxu0 %vm569_vm0, %v3164_v12 }
 0x6fe   : > { %4835 = vmatmul.mubr.msk.f32.gmra.mrb[52].mxu0 %vm569_vm0, %v4772_v28 }
 0x6ff   : > { %v4779_v3 = vpop.f32.mrb[40].mxu1 }
 0x700   : > { %v3253_v33 = vpop.f32.mrb[41].mxu1 }
 0x701   : > { %4837 = vmatprep.mubr.msk.f32.mxu0 %vm569_vm0, %v3253_v33 }
 0x702   : > { %4838 = vmatmul.mubr.msk.f32.gmra.mrb[54].mxu0 %vm569_vm0, %v4779_v3 }
 0x703   : > { %v4786_v48 = vpop.f32.mrb[44].mxu0 }
 0x704   : > { %v3342_v52 = vpop.f32.mrb[45].mxu0 }
 0x705   : > { %4840 = vmatprep.mubr.msk.f32.mxu0 %vm569_vm0, %v3342_v52 }
 0x706   : > { %4841 = vmatmul.mubr.msk.f32.gmra.mrb[56].mxu0 %vm569_vm0, %v4786_v48 }
 0x707   : > { %v4793_v53 = vpop.f32.mrb[42].mxu1 }
 0x708   : > { %v3431_v57 = vpop.f32.mrb[43].mxu1 }
 0x709   : > { %4843 = vmatprep.mubr.msk.f32.mxu0 %vm569_vm0, %v3431_v57 }
 0x70a   : > { %4844 = vmatmul.mubr.msk.f32.gmra.mrb[58].mxu0 %vm569_vm0, %v4793_v53 }
 0x70b   : > { %v4800_v60 = vpop.f32.mrb[46].mxu0 }
 0x70c   : > { %v3520_v1 = vpop.f32.mrb[47].mxu0 }
 0x70d   : > { %4846 = vmatprep.mubr.msk.f32.mxu0 %vm569_vm0, %v3520_v1 }
 0x70e   : > { %4847 = vmatmul.mubr.msk.f32.gmra.mrb[60].mxu0 %vm569_vm0, %v4800_v60 }
 0x711   : > { %v4807_v2 = vpop.f32.mrb[44].mxu1 }
 0x712   : > { %v3609_v8 = vpop.f32.mrb[45].mxu1 }
 0x713   : > { %4849 = vmatprep.mubr.msk.f32.mxu0 %vm569_vm0, %v3609_v8 }
 0x714   : > { %v4814_v13 = vpop.f32.mrb[48].mxu0  ;;  %4850 = vmatmul.mubr.msk.f32.gmra.mrb[62].mxu0 %vm569_vm0, %v4807_v2 }
 0x715   : > { %v3698_v26 = vpop.f32.mrb[49].mxu0 }
 0x716   : > { %4852 = vmatprep.mubr.msk.f32.mxu0 %vm569_vm0, %v3698_v26 }
 0x718   : > { %4853 = vmatmul.mubr.msk.f32.gmra.mrb[64].mxu0 %vm569_vm0, %v4814_v13 }
 0x721   : > { %v4873_v20 = vpop.f32.mrb[46].mxu1 }
 0x722   : > { %v4014_v37 = vpop.f32.mrb[47].mxu1 }
 0x725   : > { %v4876_v18 = vpop.f32.mrb[48].mxu1 }
 0x726   : > { %v4024_v24 = vpop.f32.mrb[49].mxu1 }
 0x729   : > { %v4879_v45 = vpop.f32.mrb[50].mxu1 }
 0x72a   : > { %v4034_v11 = vpop.f32.mrb[51].mxu1 }
 0x72d   : > { %v4882_v30 = vpop.f32.mrb[52].mxu1 }
 0x72e   : > { %v4044_v5 = vpop.f32.mrb[53].mxu1 }
 0x731   : > { %v4885_v32 = vpop.f32.mrb[54].mxu1 }
 0x732   : > { %v4054_v17 = vpop.f32.mrb[55].mxu1 }
 0x735   : > { %v4888_v55 = vpop.f32.mrb[56].mxu1 }
 0x736   : > { %v4064_v14 = vpop.f32.mrb[57].mxu1 }
 0x739   : > { %v4891_v21 = vpop.f32.mrb[58].mxu1 }
 0x73a   : > { %v4074_v51 = vpop.f32.mrb[59].mxu1 }
 0x73d   : > { %v4894_v35 = vpop.f32.mrb[60].mxu1 }
 0x73e   : > { %v6744_v0 = vpop.f32.mrb[61].mxu1 }
 0x7c9   : > { %v4833_v38 = vpop.f32.mrb[50].mxu0 }
 0x7ca   : > { %v4020_v44 = vadd.f32 %v4873_v20, %v4833_v38  ;;  %v3821_v22 = vpop.f32.mrb[51].mxu0 }
 0x7cb   : > { %v4015_v36 = vadd.f32 %v4014_v37, %v3821_v22 }
 0x7cc   : > { %v4101_v41 = vadd.f32 %v6749_v19, %v4020_v44 }
 0x7cd   : > { %v4100_v6 = vadd.f32 %v6749_v19, %v4015_v36 }
 0x7ce   : > { %4117 = vst [vmem:[%s6754_s17 + $0x8] sm:$0xff] %v4101_v41 }
 0x7cf   : > { %4116 = vst [vmem:[%s6754_s17] sm:$0xff] %v4100_v6 }
 0x7d1   : > { %v4836_v63 = vpop.f32.mrb[52].mxu0 }
 0x7d2   : > { %v4030_v40 = vadd.f32 %v4876_v18, %v4836_v63  ;;  %v3831_v23 = vpop.f32.mrb[53].mxu0 }
 0x7d3   : > { %v4025_v56 = vadd.f32 %v4024_v24, %v3831_v23 }
 0x7d4   : > { %v4103_v34 = vadd.f32 %v6749_v19, %v4030_v40 }
 0x7d5   : > { %v4102_v9 = vadd.f32 %v6749_v19, %v4025_v56  ;;  %v4839_v31 = vpop.f32.mrb[54].mxu0 }
 0x7d6   : > { %4119 = vst [vmem:[%s6754_s17 + $0x18] sm:$0xff] %v4103_v34  ;;  %v4040_v25 = vadd.f32 %v4879_v45, %v4839_v31  ;;  %v3841_v59 = vpop.f32.mrb[55].mxu0 }
 0x7d7   : > { %4118 = vst [vmem:[%s6754_s17 + $0x10] sm:$0xff] %v4102_v9  ;;  %v4035_v27 = vadd.f32 %v4034_v11, %v3841_v59 }
 0x7d8   : > { %v4105_v47 = vadd.f32 %v6749_v19, %v4040_v25 }
 0x7d9   : > { %v4104_v46 = vadd.f32 %v6749_v19, %v4035_v27  ;;  %v4842_v15 = vpop.f32.mrb[56].mxu0 }
 0x7da   : > { %4121 = vst [vmem:[%s6754_s17 + $0x28] sm:$0xff] %v4105_v47  ;;  %v4050_v62 = vadd.f32 %v4882_v30, %v4842_v15  ;;  %v3851_v7 = vpop.f32.mrb[57].mxu0 }
 0x7db   : > { %4120 = vst [vmem:[%s6754_s17 + $0x20] sm:$0xff] %v4104_v46  ;;  %v4045_v29 = vadd.f32 %v4044_v5, %v3851_v7 }
 0x7dc   : > { %v4107_v4 = vadd.f32 %v6749_v19, %v4050_v62 }
 0x7dd   : > { %v4106_v61 = vadd.f32 %v6749_v19, %v4045_v29  ;;  %v4845_v42 = vpop.f32.mrb[58].mxu0 }
 0x7de   : > { %4123 = vst [vmem:[%s6754_s17 + $0x38] sm:$0xff] %v4107_v4  ;;  %v4060_v54 = vadd.f32 %v4885_v32, %v4845_v42  ;;  %v3861_v39 = vpop.f32.mrb[59].mxu0 }
 0x7df   : > { %4122 = vst [vmem:[%s6754_s17 + $0x30] sm:$0xff] %v4106_v61  ;;  %v4055_v16 = vadd.f32 %v4054_v17, %v3861_v39 }
 0x7e0   : > { %v4109_v49 = vadd.f32 %v6749_v19, %v4060_v54 }
 0x7e1   : > { %v4108_v50 = vadd.f32 %v6749_v19, %v4055_v16  ;;  %v4848_v58 = vpop.f32.mrb[60].mxu0 }
 0x7e2   : > { %4125 = vst [vmem:[%s6754_s17 + $0x48] sm:$0xff] %v4109_v49  ;;  %v4070_v43 = vadd.f32 %v4888_v55, %v4848_v58  ;;  %v3871_v10 = vpop.f32.mrb[61].mxu0 }
 0x7e3   : > { %4124 = vst [vmem:[%s6754_s17 + $0x40] sm:$0xff] %v4108_v50  ;;  %v4065_v28 = vadd.f32 %v4064_v14, %v3871_v10 }
 0x7e4   : > { %v4111_v12 = vadd.f32 %v6749_v19, %v4070_v43 }
 0x7e5   : > { %v4110_v3 = vadd.f32 %v6749_v19, %v4065_v28 }
 0x7e6   : > { %4127 = vst [vmem:[%s6754_s17 + $0x58] sm:$0xff] %v4111_v12 }
 0x7e7   : > { %v4851_v33 = vpop.f32.mrb[62].mxu0  ;;  %4126 = vst [vmem:[%s6754_s17 + $0x50] sm:$0xff] %v4110_v3 }
 0x7e8   : > { %v4080_v48 = vadd.f32 %v4891_v21, %v4851_v33  ;;  %v3881_v52 = vpop.f32.mrb[63].mxu0 }
 0x7e9   : > { %v4075_v53 = vadd.f32 %v4074_v51, %v3881_v52 }
 0x7ea   : > { %v4113_v57 = vadd.f32 %v6749_v19, %v4080_v48 }
 0x7eb   : > { %v4112_v60 = vadd.f32 %v6749_v19, %v4075_v53  ;;  %v4854_v1 = vpop.f32.mrb[64].mxu0 }
 0x7ec   : > { %4129 = vst [vmem:[%s6754_s17 + $0x68] sm:$0xff] %v4113_v57  ;;  %v4090_v2 = vadd.f32 %v4894_v35, %v4854_v1  ;;  %v3891_v8 = vpop.f32.mrb[65].mxu0 }
 0x7ed   : > { %4128 = vst [vmem:[%s6754_s17 + $0x60] sm:$0xff] %v4112_v60  ;;  %v4085_v13 = vadd.f32 %v6744_v0, %v3891_v8 }
 0x7ee   : > { %v4115_v26 = vadd.f32 %v6749_v19, %v4090_v2 }
 0x7ef   : > { %v4114_v20 = vadd.f32 %v6749_v19, %v4085_v13 }
 0x7f0   : > { %4131 = vst [vmem:[%s6754_s17 + $0x78] sm:$0xff] %v4115_v26 }
 0x7f1   : > { %4130 = vst [vmem:[%s6754_s17 + $0x70] sm:$0xff] %v4114_v20 }
 0x7f2   : > { %5552 = shalt.err (!%p5549_p5)
}
 0x7f3   : > { %s5553_s30 = scalar_lea.hbm %s6789_s10, 2048  ;;  %s5557_s9 = scalar_lea.hbm %s6843_s5, 4096 }
 0x7f4   : > { %p5554_p9 = scmp.ne.s32.totalorder %s6789_s10, %s5553_s30  ;;  %p5558_p11 = scmp.lt.u32.totalorder %s6789_s10, %s6843_s5 }
 0x7f5   : > { %p5559_p1 = scmp.lt.u32.totalorder %s5557_s9, %s5553_s30  ;;  %p5561_p2 = scmp.lt.u32.totalorder %s5553_s30, %s6789_s10 }
 0x7f6   : > { %p5555_p0 = pnand %p5554_p9, %p6926_p13 }
 0x7f7   : > { %p5560_p12 = por %p5559_p1, %p5558_p11 }
 0x7f8   : > { %p5556_p8 = pneg %p5555_p0 }
 0x7f9   : > { %p5562_p6 = por %p5561_p2, %p5560_p12 }
 0x7fb   : > { %p5563_p10 = pnand %p5562_p6, %p5556_p8 }
 0x7fd   : > { %5566 = shalt.err (!%p5563_p10)
}
 0x7fe   : > { %s5630_s11 = smov 128   ;;  %s5631_s17 = smov 8  }
 0x7ff   : > { %5147 = dma.vmem_to_hbm [thread:$0]  (%p6926_p13), %s6791_s13, 2048, %s6789_s10, %s4133_s22, %s5630_s11, %s5630_s11, %s5631_s17  }
 0x800 PF: > { %s4161_s2 = sand.u32 1, %s5605_s18   ;;  %p6927_p4 = scmp.ne.s32.totalorder %s6868_s25, 0 }
 0x801   : > { %p6928_p7 = scmp.ge.s32.totalorder %s5617_s21, 2  ;;  %s4162_s7 = scalar_lea.sflag [#allocation4], %s4161_s2 }
 0x803   : > { %p5164_p3 = pnand %p6928_p7, %p6927_p4 }
 0x805   : > { %5600 = dma.done.wait (!%p5164_p3), %s4162_s7, 2048  }
 0x806   : > { %5602 = vsyncadd (!%p5164_p3), %s4162_s7, 4294965248  ;;  %p22_p5 = scmp.ge.s32.totalorder %s5775_s16, 4   ;;  %s6929_s18 = smov %s5609_s19 }
 0x807   : > { %s6930_s19 = smov %s5613_s20  ;;  %s6931_s20 = smov %s5784_s27 }
 0x808   : > { %s6932_s21 = smov %s5775_s16  ;;  %24 = sbr.rel (!%p22_p5) target bundleno = 11 (0xb), region = 106 }
 0x80f   :  { %4167 = vsyncpa [#allocation3], 1 }
 0x810   :  { %4169 = vsyncpa [#allocation3 + $0x1], 1 }
 0x811   :  { %4170 = vsyncpa [#allocation6], 1 }
 0x812   :  { %4172 = vsyncpa [#allocation6 + $0x1], 1 }
 0x813   :  { %4173 = vsyncpa [#allocation9], 1 }
 0x814   :  { %4174 = vsyncpa [#allocation4], 1 }
 0x815   :  { %4176 = vsyncpa [#allocation4 + $0x1], 1 }

</bundles_post_ra>
